<compile_context>
chip_gen: v6e
topology: v6e:2x2x1
jax: 0.10.0
libtpu: 0.0.40
codegen_flags: <defaults>
</compile_context>

<pallas_src>
import functools

import numpy as np
import jax
import jax.numpy as jnp
from jax import lax
from jax.experimental import pallas as pl
from jax.experimental.pallas import tpu as pltpu


# ----------------------------------------------------------------------------
# Small helpers
# ----------------------------------------------------------------------------
def _cdiv(a, b):
    return -(-a // b)


def _round_up(x, m):
    return ((x + m - 1) // m) * m


_VMEM_LIMIT_CACHE = None


def _vmem_limit_bytes():
    """Per-generation VMEM limit: ~3/4 of physical, capped at 100 MiB.

    v5e/v6e (128 MiB physical) -> ~96 MiB; v7x (64 MiB physical) -> 48 MiB.
    Falls back to a v7x-safe 48 MiB if the query is unavailable.
    """
    global _VMEM_LIMIT_CACHE
    if _VMEM_LIMIT_CACHE is None:
        cap = 64 * 1024 * 1024
        try:
            info = pltpu.get_tpu_info()
            cap = int(getattr(info, "vmem_capacity_bytes", cap))
        except Exception:
            pass
        _VMEM_LIMIT_CACHE = min(max(cap * 3 // 4, 32 * 1024 * 1024),
                                100 * 1024 * 1024)
    return _VMEM_LIMIT_CACHE


# ----------------------------------------------------------------------------
# Tiled GEMM: C = A @ B (+ bias) (+ ReLU), bf16 MXU inputs, f32 epilogue.
#   - single-K-tile fast path: no accumulator scratch, no pl.when
#   - dims that fit their cap use a single full-dim block (no padding)
#   - M tile chosen from the per-generation VMEM budget, 16-aligned,
#     >= 2 blocks when M is large (keeps both v7x TensorCores busy)
# ----------------------------------------------------------------------------
_TN_CAP = 512        # lane axis of B / out; tiled in 512s beyond this
_TK_CAP = 1024       # contraction axis; tiled in 1024s beyond this
_TM_CAP = 4096       # hard cap on rows per tile
_M_SPLIT_MIN = 1024  # above this, force >= 2 M blocks (v7x has 2 TensorCores)


def _gemm_kernel_nored(*refs, relu, has_bias):
    """K fits one tile: direct write, no scratch, no init/finalize branches."""
    if has_bias:
        a_ref, b_ref, bias_ref, o_ref = refs
    else:
        a_ref, b_ref, o_ref = refs
        bias_ref = None
    out = jnp.dot(a_ref[...].astype(jnp.bfloat16),
                  b_ref[...].astype(jnp.bfloat16),
                  preferred_element_type=jnp.float32)
    if has_bias:
        out = out + bias_ref[...]           # f32 epilogue (v5e-safe)
    if relu:
        out = jnp.maximum(out, 0.0)
    o_ref[...] = out.astype(o_ref.dtype)


def _gemm_kernel_red(*refs, relu, has_bias):
    """General path: K tiled on the innermost grid axis, f32 VMEM accumulator."""
    if has_bias:
        a_ref, b_ref, bias_ref, o_ref, acc_ref = refs
    else:
        a_ref, b_ref, o_ref, acc_ref = refs
        bias_ref = None

    k = pl.program_id(2)

    @pl.when(k == 0)
    def _():
        acc_ref[...] = jnp.zeros_like(acc_ref)

    acc_ref[...] += jnp.dot(a_ref[...].astype(jnp.bfloat16),
                            b_ref[...].astype(jnp.bfloat16),
                            preferred_element_type=jnp.float32)

    @pl.when(k == pl.num_programs(2) - 1)
    def _():
        out = acc_ref[...]
        if has_bias:
            out = out + bias_ref[...]
        if relu:
            out = jnp.maximum(out, 0.0)
        o_ref[...] = out.astype(o_ref.dtype)


def pallas_matmul(a, b, bias=None, relu=False, out_dtype=jnp.float32):
    """C = A @ B (+ bias) (+ ReLU). A:[M,K] B:[K,N] bias:[N]/[1,N] or None."""
    M, K = a.shape
    K2, N = b.shape
    assert K == K2, (K, K2)
    has_bias = bias is not None

    # ---- N (lane) axis: full-dim block when it fits the cap --------------
    if N <= _TN_CAP:
        tn, Np = N, N
    else:
        tn = _TN_CAP
        Np = _round_up(N, tn)

    # ---- K (contraction) axis --------------------------------------------
    if K <= _TK_CAP:
        tk, Kp = K, K
    else:
        tk = _TK_CAP
        Kp = _round_up(K, tk)
    k_tiled = (Kp // tk) > 1

    # ---- M (sublane) axis: VMEM-budget driven ------------------------------
    a_bytes = jnp.dtype(a.dtype).itemsize
    b_bytes = jnp.dtype(b.dtype).itemsize
    o_bytes = jnp.dtype(out_dtype).itemsize
    budget = _vmem_limit_bytes() // 2     # headroom for pipeline + compiler scratch
    per_row = 2 * tk * a_bytes + 2 * tn * o_bytes + (tn * 4 if k_tiled else 0)
    fixed = 2 * tk * tn * b_bytes + 2 * tn * 4
    tm_budget = max(16, min(_TM_CAP, (budget - fixed) // per_row))

    if M <= tm_budget and M < _M_SPLIT_MIN:
        tm, Mp = M, M                      # single full-dim block, no padding
    else:
        tm = min(tm_budget, _round_up(_cdiv(M, 2), 16))
        tm = max(16, (tm // 16) * 16)      # bf16 vregs pack 16 sublanes
        Mp = _round_up(M, tm)

    # ---- pad only when a dim is actually tiled past its true size ----------
    if (Mp, Kp) != (M, K):
        a = jnp.pad(a, ((0, Mp - M), (0, Kp - K)))
    if (Kp, Np) != (K, N):
        b = jnp.pad(b, ((0, Kp - K), (0, Np - N)))
    bias2 = None
    if has_bias:
        bias2 = bias.reshape(1, N).astype(jnp.float32)
        if Np != N:
            bias2 = jnp.pad(bias2, ((0, 0), (0, Np - N)))

    vmem_limit = _vmem_limit_bytes()

    if not k_tiled:
        grid = (Mp // tm, Np // tn)
        in_specs = [pl.BlockSpec((tm, tk), lambda i, j: (i, 0)),
                    pl.BlockSpec((tk, tn), lambda i, j: (0, j))]
        inputs = [a, b]
        if has_bias:
            in_specs.append(pl.BlockSpec((1, tn), lambda i, j: (0, j)))
            inputs.append(bias2)
        out = pl.pallas_call(
            functools.partial(_gemm_kernel_nored, relu=relu, has_bias=has_bias),
            out_shape=jax.ShapeDtypeStruct((Mp, Np), out_dtype),
            grid=grid,
            in_specs=in_specs,
            out_specs=pl.BlockSpec((tm, tn), lambda i, j: (i, j)),
            compiler_params=pltpu.CompilerParams(
                dimension_semantics=("parallel", "parallel"),
                vmem_limit_bytes=vmem_limit,
            ),
        )(*inputs)
    else:
        grid = (Mp // tm, Np // tn, Kp // tk)
        in_specs = [pl.BlockSpec((tm, tk), lambda i, j, k: (i, k)),
                    pl.BlockSpec((tk, tn), lambda i, j, k: (k, j))]
        inputs = [a, b]
        if has_bias:
            in_specs.append(pl.BlockSpec((1, tn), lambda i, j, k: (0, j)))
            inputs.append(bias2)
        out = pl.pallas_call(
            functools.partial(_gemm_kernel_red, relu=relu, has_bias=has_bias),
            out_shape=jax.ShapeDtypeStruct((Mp, Np), out_dtype),
            grid=grid,
            in_specs=in_specs,
            out_specs=pl.BlockSpec((tm, tn), lambda i, j, k: (i, j)),
            scratch_shapes=[pltpu.VMEM((tm, tn), jnp.float32)],
            compiler_params=pltpu.CompilerParams(
                dimension_semantics=("parallel", "parallel", "arbitrary"),
                vmem_limit_bytes=vmem_limit,
            ),
        )(*inputs)

    if (Mp, Np) != (M, N):
        out = out[:M, :N]                  # padded M rows hold relu(bias); drop
    return out


# ----------------------------------------------------------------------------
# Conv wrappers built on the Pallas GEMM
# ----------------------------------------------------------------------------
def conv2d_nhwc(x, w_mat, b, *, kh, kw, stride, pad, relu,
                out_dtype=jnp.bfloat16):
    """x:[N,H,W,Cin] (bf16), w_mat:[kh*kw*Cin,Cout] (bf16), b:[1,Cout] (f32)."""
    # TODO(synk): map the kh*kw taps onto a K grid axis (after a stride-phase
    # split of the padded input) so `col` is never materialized in HBM;
    # stride-2 shifted windows are not expressible as BlockSpec blocks without
    # that preprocessing, so im2col is kept in XLA here (cheap at these sizes).
    N, H, W, Cin = x.shape
    Cout = w_mat.shape[-1]
    xp = jnp.pad(x, ((0, 0), (pad, pad), (pad, pad), (0, 0)))
    Ho = (H + 2 * pad - kh) // stride + 1
    Wo = (W + 2 * pad - kw) // stride + 1
    patches = [
        xp[:, di:di + stride * Ho:stride, dj:dj + stride * Wo:stride, :]
        for di in range(kh) for dj in range(kw)
    ]
    col = jnp.concatenate(patches, axis=-1).reshape(N * Ho * Wo, kh * kw * Cin)
    y = pallas_matmul(col, w_mat, b, relu=relu, out_dtype=out_dtype)
    return y.reshape(N, Ho, Wo, Cout)


def conv1x1_nhwc(x, w, b, relu=False, out_dtype=jnp.bfloat16):
    """x:[N,H,W,Cin], w:[Cin,Cout], b:[1,Cout]."""
    N, H, W, Cin = x.shape
    Cout = w.shape[-1]
    y = pallas_matmul(x.reshape(N * H * W, Cin), w, b, relu=relu,
                      out_dtype=out_dtype)
    return y.reshape(N, H, W, Cout)


# ----------------------------------------------------------------------------
# Bilinear upsample (align_corners=False) as a channels-first VPU lerp kernel.
# Input/output are NCHW, so the result lands directly in the module's layout.
# ----------------------------------------------------------------------------
def _bilinear_matrix(out_size, in_size):
    """Row-interpolation matrix matching F.interpolate(bilinear, align_corners=False)."""
    scale = in_size / out_size
    o = np.arange(out_size)
    src = np.maximum((o + 0.5) * scale - 0.5, 0.0)
    i0 = np.minimum(np.floor(src).astype(np.int64), in_size - 1)
    i1 = np.minimum(i0 + 1, in_size - 1)
    frac = (src - i0).astype(np.float32)
    W = np.zeros((out_size, in_size), dtype=np.float32)
    W[o, i0] += 1.0 - frac
    W[o, i1] += frac
    return jnp.asarray(W)


def _resize_chw_kernel(x_ref, wr_ref, wct_ref, o_ref):
    # x_ref: [1, C, Hi, Wi]   wr_ref: [Ho, Hi]   wct_ref: [Wi, Wo]
    # o_ref: [1, C, Ho, Wo]
    c = x_ref.shape[1]
    hi, wi = x_ref.shape[2], x_ref.shape[3]
    ho, wo = o_ref.shape[2], o_ref.shape[3]

    x = x_ref[0].astype(jnp.float32)        # [C, Hi, Wi]
    wr = wr_ref[...]                        # [Ho, Hi] f32
    wct = wct_ref[...]                      # [Wi, Wo] f32

    # TODO(synk): for large Hi/Wi use the 2-tap gather form instead of the
    # dense sum over source rows (only 2 weights per output row are nonzero).
    # H pass: t[c, oh, w] = sum_i wr[oh, i] * x[c, i, w]     (VPU broadcast FMAs)
    t = jnp.zeros((c, ho, wi), jnp.float32)
    for i in range(hi):
        t = t + wr[:, i:i + 1][None, :, :] * x[:, i:i + 1, :]
    # W pass: y[c, oh, ow] = sum_j wct[j, ow] * t[c, oh, j]
    y = jnp.zeros((c, ho, wo), jnp.float32)
    for j in range(wi):
        y = y + wct[j:j + 1, :][None, :, :] * t[:, :, j:j + 1]

    o_ref[0] = y.astype(o_ref.dtype)


def bilinear_resize_nchw(x, out_hw):
    """x:[N,C,Hi,Wi] (any float dtype) -> f32 [N,C,Ho,Wo], align_corners=False."""
    # TODO(synk): fuse the classifier 1x1 (and the depth_enc operand) into this
    # kernel's prologue so the pre-resize logits never round-trip HBM.
    N, C, Hi, Wi = x.shape
    Ho, Wo = out_hw
    wr = _bilinear_matrix(Ho, Hi)            # [Ho, Hi]
    wct = jnp.transpose(_bilinear_matrix(Wo, Wi))  # [Wi, Wo]
    return pl.pallas_call(
        _resize_chw_kernel,
        out_shape=jax.ShapeDtypeStruct((N, C, Ho, Wo), jnp.float32),
        grid=(N,),
        in_specs=[
            pl.BlockSpec((1, C, Hi, Wi), lambda n: (n, 0, 0, 0)),
            pl.BlockSpec((Ho, Hi), lambda n: (0, 0)),
            pl.BlockSpec((Wi, Wo), lambda n: (0, 0)),
        ],
        out_specs=pl.BlockSpec((1, C, Ho, Wo), lambda n: (n, 0, 0, 0)),
        compiler_params=pltpu.CompilerParams(
            dimension_semantics=("parallel",),
            vmem_limit_bytes=_vmem_limit_bytes(),
        ),
    )(x, wr, wct)


def _nhwc_to_nchw(x):
    return jnp.transpose(x, (0, 3, 1, 2))


# ----------------------------------------------------------------------------
# Synthetic DDN model (add_depth_channel=True, use_depth_enc=True, aux_loss=True)
# ----------------------------------------------------------------------------
C1, C2, C3 = 8, 16, 16          # backbone channel widths
C_DEPTH_ENC = 4                 # channels of depth_enc concatenated before classifier
NUM_CLASSES = 6


def init_params(key):
    ks = jax.random.split(key, 10)
    s = 0.1
    return {
        # backbone (conv1 takes 4 channels: RGB + projected depth)
        "conv1_w": jax.random.normal(ks[0], (3, 3, 4, C1), jnp.float32) * s,
        "conv1_b": jax.random.normal(ks[1], (C1,), jnp.float32) * s,
        "conv2_w": jax.random.normal(ks[2], (3, 3, C1, C2), jnp.float32) * s,
        "conv2_b": jax.random.normal(ks[3], (C2,), jnp.float32) * s,
        "conv3_w": jax.random.normal(ks[4], (3, 3, C2, C3), jnp.float32) * s,
        "conv3_b": jax.random.normal(ks[5], (C3,), jnp.float32) * s,
        # classifier (1x1) on 'out' features concatenated with depth_enc
        "cls_w": jax.random.normal(ks[6], (C3 + C_DEPTH_ENC, NUM_CLASSES), jnp.float32) * s,
        "cls_b": jax.random.normal(ks[7], (NUM_CLASSES,), jnp.float32) * s,
        # aux classifier (1x1) on 'aux' features
        "aux_w": jax.random.normal(ks[8], (C2, NUM_CLASSES), jnp.float32) * s,
        "aux_b": jax.random.normal(ks[9], (NUM_CLASSES,), jnp.float32) * s,
    }


def prepare_params(p):
    """Reshape + cast weights once, outside the jitted forward."""
    def conv_w(w):
        kh, kw, ci, co = w.shape
        return w.reshape(kh * kw * ci, co).astype(jnp.bfloat16)

    def vec_b(b):
        return b.reshape(1, -1).astype(jnp.float32)

    return {
        "conv1_w": conv_w(p["conv1_w"]), "conv1_b": vec_b(p["conv1_b"]),
        "conv2_w": conv_w(p["conv2_w"]), "conv2_b": vec_b(p["conv2_b"]),
        "conv3_w": conv_w(p["conv3_w"]), "conv3_b": vec_b(p["conv3_b"]),
        "cls_w": p["cls_w"].astype(jnp.bfloat16), "cls_b": vec_b(p["cls_b"]),
        "aux_w": p["aux_w"].astype(jnp.bfloat16), "aux_b": vec_b(p["aux_b"]),
    }


def ddn_forward(prep, images, depth_enc, projected_depth):
    """Mirrors DDNTemplate.forward.  Boundary tensors are NCHW / f32."""
    # add_depth_channel: concat along channels, go channels-last + bf16
    x = jnp.concatenate([images, projected_depth], axis=1)           # [N,4,H,W]
    x = jnp.transpose(x, (0, 2, 3, 1)).astype(jnp.bfloat16)          # NHWC bf16

    # backbone with return_layers {'features', 'aux', 'out'} (bf16 activations)
    feat = conv2d_nhwc(x, prep["conv1_w"], prep["conv1_b"],
                       kh=3, kw=3, stride=2, pad=1, relu=True)
    aux_feat = conv2d_nhwc(feat, prep["conv2_w"], prep["conv2_b"],
                           kh=3, kw=3, stride=2, pad=1, relu=True)
    out_feat = conv2d_nhwc(aux_feat, prep["conv3_w"], prep["conv3_b"],
                           kh=3, kw=3, stride=2, pad=1, relu=True)

    result = {}
    result["features"] = _nhwc_to_nchw(feat).astype(jnp.float32)
    feat_shape = feat.shape[1:3]                                     # (H_out, W_out)
    result["image_features_out"] = _nhwc_to_nchw(out_feat).astype(jnp.float32)

    # use_depth_enc: concat depth encoding before classifier
    de = jnp.transpose(depth_enc, (0, 2, 3, 1)).astype(jnp.bfloat16)
    xc = jnp.concatenate([out_feat, de], axis=-1)
    logits = conv1x1_nhwc(xc, prep["cls_w"], prep["cls_b"],
                          out_dtype=jnp.bfloat16)
    result["logits"] = bilinear_resize_nchw(_nhwc_to_nchw(logits), feat_shape)

    # aux classifier branch
    aux = conv1x1_nhwc(aux_feat, prep["aux_w"], prep["aux_b"],
                       out_dtype=jnp.bfloat16)
    result["aux"] = bilinear_resize_nchw(_nhwc_to_nchw(aux), feat_shape)
    return result


# ----------------------------------------------------------------------------
# Pure-JAX f32 reference (correctness sanity check)
# ----------------------------------------------------------------------------
def _ref_conv(x, w, b, stride):
    y = lax.conv_general_dilated(
        x, w, (stride, stride), [(1, 1), (1, 1)],
        dimension_numbers=("NHWC", "HWIO", "NHWC"),
    )
    return jax.nn.relu(y + b)


def _ref_resize(x, hw):
    N, Hi, Wi, C = x.shape
    Ho, Wo = hw
    Wr = _bilinear_matrix(Ho, Hi)
    Wc = _bilinear_matrix(Wo, Wi)
    return jnp.einsum("op,npqc,rq->norc", Wr, x, Wc)


def reference_forward(params, images, depth_enc, projected_depth):
    x = jnp.concatenate([images, projected_depth], axis=1)
    x = jnp.transpose(x, (0, 2, 3, 1))
    feat = _ref_conv(x, params["conv1_w"], params["conv1_b"], 2)
    aux_feat = _ref_conv(feat, params["conv2_w"], params["conv2_b"], 2)
    out_feat = _ref_conv(aux_feat, params["conv3_w"], params["conv3_b"], 2)
    result = {}
    result["features"] = _nhwc_to_nchw(feat)
    feat_shape = feat.shape[1:3]
    result["image_features_out"] = _nhwc_to_nchw(out_feat)
    de = jnp.transpose(depth_enc, (0, 2, 3, 1))
    xc = jnp.concatenate([out_feat, de], axis=-1)
    logits = jnp.einsum("nhwc,cd->nhwd", xc, params["cls_w"]) + params["cls_b"]
    result["logits"] = _nhwc_to_nchw(_ref_resize(logits, feat_shape))
    aux = jnp.einsum("nhwc,cd->nhwd", aux_feat, params["aux_w"]) + params["aux_b"]
    result["aux"] = _nhwc_to_nchw(_ref_resize(aux, feat_shape))
    return result


if __name__ == "__main__":
    key = jax.random.PRNGKey(0)
    k_img, k_pd, k_de = jax.random.split(key, 3)
    N, H, W = 2, 16, 16
    images = jax.random.normal(k_img, (N, 3, H, W), jnp.float32)
    projected_depth = jax.random.normal(k_pd, (N, 1, H, W), jnp.float32)
    depth_enc = jax.random.normal(k_de, (N, C_DEPTH_ENC, H // 8, W // 8), jnp.float32)

    params = init_params(jax.random.PRNGKey(1))
    prep = prepare_params(params)

    fwd = jax.jit(functools.partial(ddn_forward, prep))
    out = fwd(images, depth_enc, projected_depth)
    jax.block_until_ready(out)

    ref = reference_forward(params, images, depth_enc, projected_depth)
    for name in ("features", "image_features_out", "logits", "aux"):
        np.testing.assert_allclose(
            np.asarray(out[name]), np.asarray(ref[name]), atol=2e-2, rtol=2e-2
        )

    print("KERNEL_OK")
</pallas_src>

<mosaic_0001>
module attributes {stable_mosaic.version = 11 : i64} {
  func.func @_gemm_kernel_nored(%arg0: i32, %arg1: i32, %arg2: memref<128x36xbf16, #tpu.memory_space<vmem>>, %arg3: memref<36x8xbf16, #tpu.memory_space<vmem>>, %arg4: memref<1x8xf32, #tpu.memory_space<vmem>>, %arg5: memref<128x8xbf16, #tpu.memory_space<vmem>>) attributes {dimension_semantics = [#tpu.dimension_semantics<parallel>, #tpu.dimension_semantics<parallel>], iteration_bounds = array<i64: 1, 1>, scalar_prefetch = 0 : i64, scratch_operands = 0 : i64, tpu.core_type = #tpu.core_type<tc>, window_params = [{transform_indices = @transform_0, window_bounds = array<i64: 128, 36>}, {transform_indices = @transform_1, window_bounds = array<i64: 36, 8>}, {transform_indices = @transform_2, window_bounds = array<i64: 1, 8>}, {transform_indices = @transform_3, window_bounds = array<i64: 128, 8>}]} {
    %c0 = arith.constant 0 : index
    %c0_0 = arith.constant 0 : index
    %0 = vector.load %arg2[%c0, %c0_0] : memref<128x36xbf16, #tpu.memory_space<vmem>>, vector<128x36xbf16>
    %c0_1 = arith.constant 0 : index
    %c0_2 = arith.constant 0 : index
    %1 = vector.load %arg3[%c0_1, %c0_2] : memref<36x8xbf16, #tpu.memory_space<vmem>>, vector<36x8xbf16>
    %cst = arith.constant dense<0.000000e+00> : vector<128x8xf32>
    %2 = tpu.matmul %0, %1, %cst {dimension_numbers = #tpu.dot_dimension_numbers<[1], [0], [0], [1], [0, 0, 1, 1], [], []>} : vector<128x36xbf16>, vector<36x8xbf16>, vector<128x8xf32> -> vector<128x8xf32>
    %c0_3 = arith.constant 0 : index
    %c0_4 = arith.constant 0 : index
    %3 = vector.load %arg4[%c0_3, %c0_4] : memref<1x8xf32, #tpu.memory_space<vmem>>, vector<1x8xf32>
    %4 = vector.broadcast %3 : vector<1x8xf32> to vector<128x8xf32>
    %5 = arith.addf %2, %4 : vector<128x8xf32>
    %cst_5 = arith.constant 0.000000e+00 : f32
    %6 = vector.broadcast %cst_5 : f32 to vector<128x8xf32>
    %7 = arith.maximumf %5, %6 : vector<128x8xf32>
    %8 = arith.truncf %7 : vector<128x8xf32> to vector<128x8xbf16>
    %c0_6 = arith.constant 0 : index
    %c0_7 = arith.constant 0 : index
    %9 = vector.load %arg5[%c0_6, %c0_7] : memref<128x8xbf16, #tpu.memory_space<vmem>>, vector<128x8xbf16>
    tpu.vector_store %arg5[%c0_6, %c0_7], %8 {strides = array<i32>} : memref<128x8xbf16, #tpu.memory_space<vmem>>, vector<128x8xbf16>,
    return
  }
  func.func @transform_0(%arg0: i32, %arg1: i32) -> (i32, i32) {
    %c0_i32 = arith.constant 0 : i32
    %c0_i32_0 = arith.constant 0 : i32
    return %arg0, %c0_i32 : i32, i32
  }
  func.func @transform_1(%arg0: i32, %arg1: i32) -> (i32, i32) {
    %c0_i32 = arith.constant 0 : i32
    %c0_i32_0 = arith.constant 0 : i32
    return %c0_i32, %arg1 : i32, i32
  }
  func.func @transform_2(%arg0: i32, %arg1: i32) -> (i32, i32) {
    %c0_i32 = arith.constant 0 : i32
    %c0_i32_0 = arith.constant 0 : i32
    return %c0_i32, %arg1 : i32, i32
  }
  func.func @transform_3(%arg0: i32, %arg1: i32) -> (i32, i32) {
    %c0_i32 = arith.constant 0 : i32
    return %arg0, %arg1 : i32, i32
  }
}

module attributes {stable_mosaic.version = 11 : i64} {
  func.func @_gemm_kernel_nored(%arg0: i32, %arg1: i32, %arg2: memref<32x72xbf16, #tpu.memory_space<vmem>>, %arg3: memref<72x16xbf16, #tpu.memory_space<vmem>>, %arg4: memref<1x16xf32, #tpu.memory_space<vmem>>, %arg5: memref<32x16xbf16, #tpu.memory_space<vmem>>) attributes {dimension_semantics = [#tpu.dimension_semantics<parallel>, #tpu.dimension_semantics<parallel>], iteration_bounds = array<i64: 1, 1>, scalar_prefetch = 0 : i64, scratch_operands = 0 : i64, tpu.core_type = #tpu.core_type<tc>, window_params = [{transform_indices = @transform_0, window_bounds = array<i64: 32, 72>}, {transform_indices = @transform_1, window_bounds = array<i64: 72, 16>}, {transform_indices = @transform_2, window_bounds = array<i64: 1, 16>}, {transform_indices = @transform_3, window_bounds = array<i64: 32, 16>}]} {
    %c0 = arith.constant 0 : index
    %c0_0 = arith.constant 0 : index
    %0 = vector.load %arg2[%c0, %c0_0] : memref<32x72xbf16, #tpu.memory_space<vmem>>, vector<32x72xbf16>
    %c0_1 = arith.constant 0 : index
    %c0_2 = arith.constant 0 : index
    %1 = vector.load %arg3[%c0_1, %c0_2] : memref<72x16xbf16, #tpu.memory_space<vmem>>, vector<72x16xbf16>
    %cst = arith.constant dense<0.000000e+00> : vector<32x16xf32>
    %2 = tpu.matmul %0, %1, %cst {dimension_numbers = #tpu.dot_dimension_numbers<[1], [0], [0], [1], [0, 0, 1, 1], [], []>} : vector<32x72xbf16>, vector<72x16xbf16>, vector<32x16xf32> -> vector<32x16xf32>
    %c0_3 = arith.constant 0 : index
    %c0_4 = arith.constant 0 : index
    %3 = vector.load %arg4[%c0_3, %c0_4] : memref<1x16xf32, #tpu.memory_space<vmem>>, vector<1x16xf32>
    %4 = vector.broadcast %3 : vector<1x16xf32> to vector<32x16xf32>
    %5 = arith.addf %2, %4 : vector<32x16xf32>
    %cst_5 = arith.constant 0.000000e+00 : f32
    %6 = vector.broadcast %cst_5 : f32 to vector<32x16xf32>
    %7 = arith.maximumf %5, %6 : vector<32x16xf32>
    %8 = arith.truncf %7 : vector<32x16xf32> to vector<32x16xbf16>
    %c0_6 = arith.constant 0 : index
    %c0_7 = arith.constant 0 : index
    %9 = vector.load %arg5[%c0_6, %c0_7] : memref<32x16xbf16, #tpu.memory_space<vmem>>, vector<32x16xbf16>
    tpu.vector_store %arg5[%c0_6, %c0_7], %8 {strides = array<i32>} : memref<32x16xbf16, #tpu.memory_space<vmem>>, vector<32x16xbf16>,
    return
  }
  func.func @transform_0(%arg0: i32, %arg1: i32) -> (i32, i32) {
    %c0_i32 = arith.constant 0 : i32
    %c0_i32_0 = arith.constant 0 : i32
    return %arg0, %c0_i32 : i32, i32
  }
  func.func @transform_1(%arg0: i32, %arg1: i32) -> (i32, i32) {
    %c0_i32 = arith.constant 0 : i32
    %c0_i32_0 = arith.constant 0 : i32
    return %c0_i32, %arg1 : i32, i32
  }
  func.func @transform_2(%arg0: i32, %arg1: i32) -> (i32, i32) {
    %c0_i32 = arith.constant 0 : i32
    %c0_i32_0 = arith.constant 0 : i32
    return %c0_i32, %arg1 : i32, i32
  }
  func.func @transform_3(%arg0: i32, %arg1: i32) -> (i32, i32) {
    %c0_i32 = arith.constant 0 : i32
    return %arg0, %arg1 : i32, i32
  }
}

module attributes {stable_mosaic.version = 11 : i64} {
  func.func @_gemm_kernel_nored(%arg0: i32, %arg1: i32, %arg2: memref<8x20xbf16, #tpu.memory_space<vmem>>, %arg3: memref<20x6xbf16, #tpu.memory_space<vmem>>, %arg4: memref<1x6xf32, #tpu.memory_space<vmem>>, %arg5: memref<8x6xbf16, #tpu.memory_space<vmem>>) attributes {dimension_semantics = [#tpu.dimension_semantics<parallel>, #tpu.dimension_semantics<parallel>], iteration_bounds = array<i64: 1, 1>, scalar_prefetch = 0 : i64, scratch_operands = 0 : i64, tpu.core_type = #tpu.core_type<tc>, window_params = [{transform_indices = @transform_0, window_bounds = array<i64: 8, 20>}, {transform_indices = @transform_1, window_bounds = array<i64: 20, 6>}, {transform_indices = @transform_2, window_bounds = array<i64: 1, 6>}, {transform_indices = @transform_3, window_bounds = array<i64: 8, 6>}]} {
    %c0 = arith.constant 0 : index
    %c0_0 = arith.constant 0 : index
    %0 = vector.load %arg2[%c0, %c0_0] : memref<8x20xbf16, #tpu.memory_space<vmem>>, vector<8x20xbf16>
    %c0_1 = arith.constant 0 : index
    %c0_2 = arith.constant 0 : index
    %1 = vector.load %arg3[%c0_1, %c0_2] : memref<20x6xbf16, #tpu.memory_space<vmem>>, vector<20x6xbf16>
    %cst = arith.constant dense<0.000000e+00> : vector<8x6xf32>
    %2 = tpu.matmul %0, %1, %cst {dimension_numbers = #tpu.dot_dimension_numbers<[1], [0], [0], [1], [0, 0, 1, 1], [], []>} : vector<8x20xbf16>, vector<20x6xbf16>, vector<8x6xf32> -> vector<8x6xf32>
    %c0_3 = arith.constant 0 : index
    %c0_4 = arith.constant 0 : index
    %3 = vector.load %arg4[%c0_3, %c0_4] : memref<1x6xf32, #tpu.memory_space<vmem>>, vector<1x6xf32>
    %4 = vector.broadcast %3 : vector<1x6xf32> to vector<8x6xf32>
    %5 = arith.addf %2, %4 : vector<8x6xf32>
    %6 = arith.truncf %5 : vector<8x6xf32> to vector<8x6xbf16>
    %c0_5 = arith.constant 0 : index
    %c0_6 = arith.constant 0 : index
    %7 = vector.load %arg5[%c0_5, %c0_6] : memref<8x6xbf16, #tpu.memory_space<vmem>>, vector<8x6xbf16>
    tpu.vector_store %arg5[%c0_5, %c0_6], %6 {strides = array<i32>} : memref<8x6xbf16, #tpu.memory_space<vmem>>, vector<8x6xbf16>,
    return
  }
  func.func @transform_0(%arg0: i32, %arg1: i32) -> (i32, i32) {
    %c0_i32 = arith.constant 0 : i32
    %c0_i32_0 = arith.constant 0 : i32
    return %arg0, %c0_i32 : i32, i32
  }
  func.func @transform_1(%arg0: i32, %arg1: i32) -> (i32, i32) {
    %c0_i32 = arith.constant 0 : i32
    %c0_i32_0 = arith.constant 0 : i32
    return %c0_i32, %arg1 : i32, i32
  }
  func.func @transform_2(%arg0: i32, %arg1: i32) -> (i32, i32) {
    %c0_i32 = arith.constant 0 : i32
    %c0_i32_0 = arith.constant 0 : i32
    return %c0_i32, %arg1 : i32, i32
  }
  func.func @transform_3(%arg0: i32, %arg1: i32) -> (i32, i32) {
    %c0_i32 = arith.constant 0 : i32
    return %arg0, %arg1 : i32, i32
  }
}

module attributes {stable_mosaic.version = 11 : i64} {
  func.func @_gemm_kernel_nored(%arg0: i32, %arg1: i32, %arg2: memref<8x144xbf16, #tpu.memory_space<vmem>>, %arg3: memref<144x16xbf16, #tpu.memory_space<vmem>>, %arg4: memref<1x16xf32, #tpu.memory_space<vmem>>, %arg5: memref<8x16xbf16, #tpu.memory_space<vmem>>) attributes {dimension_semantics = [#tpu.dimension_semantics<parallel>, #tpu.dimension_semantics<parallel>], iteration_bounds = array<i64: 1, 1>, scalar_prefetch = 0 : i64, scratch_operands = 0 : i64, tpu.core_type = #tpu.core_type<tc>, window_params = [{transform_indices = @transform_0, window_bounds = array<i64: 8, 144>}, {transform_indices = @transform_1, window_bounds = array<i64: 144, 16>}, {transform_indices = @transform_2, window_bounds = array<i64: 1, 16>}, {transform_indices = @transform_3, window_bounds = array<i64: 8, 16>}]} {
    %c0 = arith.constant 0 : index
    %c0_0 = arith.constant 0 : index
    %0 = vector.load %arg2[%c0, %c0_0] : memref<8x144xbf16, #tpu.memory_space<vmem>>, vector<8x144xbf16>
    %c0_1 = arith.constant 0 : index
    %c0_2 = arith.constant 0 : index
    %1 = vector.load %arg3[%c0_1, %c0_2] : memref<144x16xbf16, #tpu.memory_space<vmem>>, vector<144x16xbf16>
    %cst = arith.constant dense<0.000000e+00> : vector<8x16xf32>
    %2 = tpu.matmul %0, %1, %cst {dimension_numbers = #tpu.dot_dimension_numbers<[1], [0], [0], [1], [0, 0, 1, 1], [], []>} : vector<8x144xbf16>, vector<144x16xbf16>, vector<8x16xf32> -> vector<8x16xf32>
    %c0_3 = arith.constant 0 : index
    %c0_4 = arith.constant 0 : index
    %3 = vector.load %arg4[%c0_3, %c0_4] : memref<1x16xf32, #tpu.memory_space<vmem>>, vector<1x16xf32>
    %4 = vector.broadcast %3 : vector<1x16xf32> to vector<8x16xf32>
    %5 = arith.addf %2, %4 : vector<8x16xf32>
    %cst_5 = arith.constant 0.000000e+00 : f32
    %6 = vector.broadcast %cst_5 : f32 to vector<8x16xf32>
    %7 = arith.maximumf %5, %6 : vector<8x16xf32>
    %8 = arith.truncf %7 : vector<8x16xf32> to vector<8x16xbf16>
    %c0_6 = arith.constant 0 : index
    %c0_7 = arith.constant 0 : index
    %9 = vector.load %arg5[%c0_6, %c0_7] : memref<8x16xbf16, #tpu.memory_space<vmem>>, vector<8x16xbf16>
    tpu.vector_store %arg5[%c0_6, %c0_7], %8 {strides = array<i32>} : memref<8x16xbf16, #tpu.memory_space<vmem>>, vector<8x16xbf16>,
    return
  }
  func.func @transform_0(%arg0: i32, %arg1: i32) -> (i32, i32) {
    %c0_i32 = arith.constant 0 : i32
    %c0_i32_0 = arith.constant 0 : i32
    return %arg0, %c0_i32 : i32, i32
  }
  func.func @transform_1(%arg0: i32, %arg1: i32) -> (i32, i32) {
    %c0_i32 = arith.constant 0 : i32
    %c0_i32_0 = arith.constant 0 : i32
    return %c0_i32, %arg1 : i32, i32
  }
  func.func @transform_2(%arg0: i32, %arg1: i32) -> (i32, i32) {
    %c0_i32 = arith.constant 0 : i32
    %c0_i32_0 = arith.constant 0 : i32
    return %c0_i32, %arg1 : i32, i32
  }
  func.func @transform_3(%arg0: i32, %arg1: i32) -> (i32, i32) {
    %c0_i32 = arith.constant 0 : i32
    return %arg0, %arg1 : i32, i32
  }
}

module attributes {stable_mosaic.version = 11 : i64} {
  func.func @_resize_chw_kernel(%arg0: i32, %arg1: memref<1x6x2x2xbf16, #tpu.memory_space<vmem>>, %arg2: memref<8x2xf32, #tpu.memory_space<vmem>>, %arg3: memref<2x8xf32, #tpu.memory_space<vmem>>, %arg4: memref<1x6x8x8xf32, #tpu.memory_space<vmem>>) attributes {dimension_semantics = [#tpu.dimension_semantics<parallel>], iteration_bounds = array<i64: 2>, scalar_prefetch = 0 : i64, scratch_operands = 0 : i64, tpu.core_type = #tpu.core_type<tc>, window_params = [{transform_indices = @transform_0, window_bounds = array<i64: 1, 6, 2, 2>}, {pipeline_mode = #tpu.pipeline_mode<synchronous>, transform_indices = @transform_1, window_bounds = array<i64: 8, 2>}, {pipeline_mode = #tpu.pipeline_mode<synchronous>, transform_indices = @transform_2, window_bounds = array<i64: 2, 8>}, {transform_indices = @transform_3, window_bounds = array<i64: 1, 6, 8, 8>}]} {
    %c0 = arith.constant 0 : index
    %c0_0 = arith.constant 0 : index
    %c0_1 = arith.constant 0 : index
    %c0_2 = arith.constant 0 : index
    %0 = vector.load %arg1[%c0, %c0_0, %c0_1, %c0_2] : memref<1x6x2x2xbf16, #tpu.memory_space<vmem>>, vector<1x6x2x2xbf16>
    %1 = vector.shape_cast %0 : vector<1x6x2x2xbf16> to vector<6x2x2xbf16>
    %2 = arith.extf %1 : vector<6x2x2xbf16> to vector<6x2x2xf32>
    %c0_3 = arith.constant 0 : index
    %c0_4 = arith.constant 0 : index
    %3 = vector.load %arg2[%c0_3, %c0_4] : memref<8x2xf32, #tpu.memory_space<vmem>>, vector<8x2xf32>
    %c0_5 = arith.constant 0 : index
    %c0_6 = arith.constant 0 : index
    %4 = vector.load %arg3[%c0_5, %c0_6] : memref<2x8xf32, #tpu.memory_space<vmem>>, vector<2x8xf32>
    %cst = arith.constant 0.000000e+00 : f32
    %5 = vector.broadcast %cst : f32 to vector<6x8x2xf32>
    %6 = vector.extract_strided_slice %3 {offsets = [0, 0], sizes = [8, 1], strides = [1, 1]} : vector<8x2xf32> to vector<8x1xf32>
    %7 = vector.shape_cast %6 : vector<8x1xf32> to vector<1x8x1xf32>
    %8 = vector.extract_strided_slice %2 {offsets = [0, 0, 0], sizes = [6, 1, 2], strides = [1, 1, 1]} : vector<6x2x2xf32> to vector<6x1x2xf32>
    %9 = vector.broadcast %7 : vector<1x8x1xf32> to vector<6x8x2xf32>
    %10 = vector.broadcast %8 : vector<6x1x2xf32> to vector<6x8x2xf32>
    %11 = arith.mulf %9, %10 : vector<6x8x2xf32>
    %12 = arith.addf %5, %11 : vector<6x8x2xf32>
    %13 = vector.extract_strided_slice %3 {offsets = [0, 1], sizes = [8, 1], strides = [1, 1]} : vector<8x2xf32> to vector<8x1xf32>
    %14 = vector.shape_cast %13 : vector<8x1xf32> to vector<1x8x1xf32>
    %15 = vector.extract_strided_slice %2 {offsets = [0, 1, 0], sizes = [6, 1, 2], strides = [1, 1, 1]} : vector<6x2x2xf32> to vector<6x1x2xf32>
    %16 = vector.broadcast %14 : vector<1x8x1xf32> to vector<6x8x2xf32>
    %17 = vector.broadcast %15 : vector<6x1x2xf32> to vector<6x8x2xf32>
    %18 = arith.mulf %16, %17 : vector<6x8x2xf32>
    %19 = arith.addf %12, %18 : vector<6x8x2xf32>
    %cst_7 = arith.constant 0.000000e+00 : f32
    %20 = vector.broadcast %cst_7 : f32 to vector<6x8x8xf32>
    %21 = vector.extract_strided_slice %4 {offsets = [0, 0], sizes = [1, 8], strides = [1, 1]} : vector<2x8xf32> to vector<1x8xf32>
    %22 = vector.shape_cast %21 : vector<1x8xf32> to vector<1x1x8xf32>
    %23 = vector.extract_strided_slice %19 {offsets = [0, 0, 0], sizes = [6, 8, 1], strides = [1, 1, 1]} : vector<6x8x2xf32> to vector<6x8x1xf32>
    %24 = vector.broadcast %22 : vector<1x1x8xf32> to vector<6x8x8xf32>
    %25 = vector.broadcast %23 : vector<6x8x1xf32> to vector<6x8x8xf32>
    %26 = arith.mulf %24, %25 : vector<6x8x8xf32>
    %27 = arith.addf %20, %26 : vector<6x8x8xf32>
    %28 = vector.extract_strided_slice %4 {offsets = [1, 0], sizes = [1, 8], strides = [1, 1]} : vector<2x8xf32> to vector<1x8xf32>
    %29 = vector.shape_cast %28 : vector<1x8xf32> to vector<1x1x8xf32>
    %30 = vector.extract_strided_slice %19 {offsets = [0, 0, 1], sizes = [6, 8, 1], strides = [1, 1, 1]} : vector<6x8x2xf32> to vector<6x8x1xf32>
    %31 = vector.broadcast %29 : vector<1x1x8xf32> to vector<6x8x8xf32>
    %32 = vector.broadcast %30 : vector<6x8x1xf32> to vector<6x8x8xf32>
    %33 = arith.mulf %31, %32 : vector<6x8x8xf32>
    %34 = arith.addf %27, %33 : vector<6x8x8xf32>
    %c0_8 = arith.constant 0 : index
    %c0_9 = arith.constant 0 : index
    %c0_10 = arith.constant 0 : index
    %c0_11 = arith.constant 0 : index
    %35 = vector.load %arg4[%c0_8, %c0_9, %c0_10, %c0_11] : memref<1x6x8x8xf32, #tpu.memory_space<vmem>>, vector<1x6x8x8xf32>
    %36 = vector.shape_cast %35 : vector<1x6x8x8xf32> to vector<6x8x8xf32>
    %37 = vector.shape_cast %34 : vector<6x8x8xf32> to vector<1x6x8x8xf32>
    tpu.vector_store %arg4[%c0_8, %c0_9, %c0_10, %c0_11], %37 {strides = array<i32>} : memref<1x6x8x8xf32, #tpu.memory_space<vmem>>, vector<1x6x8x8xf32>,
    return
  }
  func.func @transform_0(%arg0: i32) -> (i32, i32, i32, i32) {
    %c0_i32 = arith.constant 0 : i32
    %c0_i32_0 = arith.constant 0 : i32
    %c0_i32_1 = arith.constant 0 : i32
    %c0_i32_2 = arith.constant 0 : i32
    return %arg0, %c0_i32, %c0_i32_0, %c0_i32_1 : i32, i32, i32, i32
  }
  func.func @transform_1(%arg0: i32) -> (i32, i32) {
    %c0_i32 = arith.constant 0 : i32
    %c0_i32_0 = arith.constant 0 : i32
    %c0_i32_1 = arith.constant 0 : i32
    return %c0_i32, %c0_i32_0 : i32, i32
  }
  func.func @transform_2(%arg0: i32) -> (i32, i32) {
    %c0_i32 = arith.constant 0 : i32
    %c0_i32_0 = arith.constant 0 : i32
    %c0_i32_1 = arith.constant 0 : i32
    return %c0_i32, %c0_i32_0 : i32, i32
  }
  func.func @transform_3(%arg0: i32) -> (i32, i32, i32, i32) {
    %c0_i32 = arith.constant 0 : i32
    %c0_i32_0 = arith.constant 0 : i32
    %c0_i32_1 = arith.constant 0 : i32
    %c0_i32_2 = arith.constant 0 : i32
    return %arg0, %c0_i32, %c0_i32_0, %c0_i32_1 : i32, i32, i32, i32
  }
}

module attributes {stable_mosaic.version = 11 : i64} {
  func.func @_gemm_kernel_nored(%arg0: i32, %arg1: i32, %arg2: memref<32x16xbf16, #tpu.memory_space<vmem>>, %arg3: memref<16x6xbf16, #tpu.memory_space<vmem>>, %arg4: memref<1x6xf32, #tpu.memory_space<vmem>>, %arg5: memref<32x6xbf16, #tpu.memory_space<vmem>>) attributes {dimension_semantics = [#tpu.dimension_semantics<parallel>, #tpu.dimension_semantics<parallel>], iteration_bounds = array<i64: 1, 1>, scalar_prefetch = 0 : i64, scratch_operands = 0 : i64, tpu.core_type = #tpu.core_type<tc>, window_params = [{transform_indices = @transform_0, window_bounds = array<i64: 32, 16>}, {transform_indices = @transform_1, window_bounds = array<i64: 16, 6>}, {transform_indices = @transform_2, window_bounds = array<i64: 1, 6>}, {transform_indices = @transform_3, window_bounds = array<i64: 32, 6>}]} {
    %c0 = arith.constant 0 : index
    %c0_0 = arith.constant 0 : index
    %0 = vector.load %arg2[%c0, %c0_0] : memref<32x16xbf16, #tpu.memory_space<vmem>>, vector<32x16xbf16>
    %c0_1 = arith.constant 0 : index
    %c0_2 = arith.constant 0 : index
    %1 = vector.load %arg3[%c0_1, %c0_2] : memref<16x6xbf16, #tpu.memory_space<vmem>>, vector<16x6xbf16>
    %cst = arith.constant dense<0.000000e+00> : vector<32x6xf32>
    %2 = tpu.matmul %0, %1, %cst {dimension_numbers = #tpu.dot_dimension_numbers<[1], [0], [0], [1], [0, 0, 1, 1], [], []>} : vector<32x16xbf16>, vector<16x6xbf16>, vector<32x6xf32> -> vector<32x6xf32>
    %c0_3 = arith.constant 0 : index
    %c0_4 = arith.constant 0 : index
    %3 = vector.load %arg4[%c0_3, %c0_4] : memref<1x6xf32, #tpu.memory_space<vmem>>, vector<1x6xf32>
    %4 = vector.broadcast %3 : vector<1x6xf32> to vector<32x6xf32>
    %5 = arith.addf %2, %4 : vector<32x6xf32>
    %6 = arith.truncf %5 : vector<32x6xf32> to vector<32x6xbf16>
    %c0_5 = arith.constant 0 : index
    %c0_6 = arith.constant 0 : index
    %7 = vector.load %arg5[%c0_5, %c0_6] : memref<32x6xbf16, #tpu.memory_space<vmem>>, vector<32x6xbf16>
    tpu.vector_store %arg5[%c0_5, %c0_6], %6 {strides = array<i32>} : memref<32x6xbf16, #tpu.memory_space<vmem>>, vector<32x6xbf16>,
    return
  }
  func.func @transform_0(%arg0: i32, %arg1: i32) -> (i32, i32) {
    %c0_i32 = arith.constant 0 : i32
    %c0_i32_0 = arith.constant 0 : i32
    return %arg0, %c0_i32 : i32, i32
  }
  func.func @transform_1(%arg0: i32, %arg1: i32) -> (i32, i32) {
    %c0_i32 = arith.constant 0 : i32
    %c0_i32_0 = arith.constant 0 : i32
    return %c0_i32, %arg1 : i32, i32
  }
  func.func @transform_2(%arg0: i32, %arg1: i32) -> (i32, i32) {
    %c0_i32 = arith.constant 0 : i32
    %c0_i32_0 = arith.constant 0 : i32
    return %c0_i32, %arg1 : i32, i32
  }
  func.func @transform_3(%arg0: i32, %arg1: i32) -> (i32, i32) {
    %c0_i32 = arith.constant 0 : i32
    return %arg0, %arg1 : i32, i32
  }
}

module attributes {stable_mosaic.version = 11 : i64} {
  func.func @_resize_chw_kernel(%arg0: i32, %arg1: memref<1x6x4x4xbf16, #tpu.memory_space<vmem>>, %arg2: memref<8x4xf32, #tpu.memory_space<vmem>>, %arg3: memref<4x8xf32, #tpu.memory_space<vmem>>, %arg4: memref<1x6x8x8xf32, #tpu.memory_space<vmem>>) attributes {dimension_semantics = [#tpu.dimension_semantics<parallel>], iteration_bounds = array<i64: 2>, scalar_prefetch = 0 : i64, scratch_operands = 0 : i64, tpu.core_type = #tpu.core_type<tc>, window_params = [{transform_indices = @transform_0, window_bounds = array<i64: 1, 6, 4, 4>}, {pipeline_mode = #tpu.pipeline_mode<synchronous>, transform_indices = @transform_1, window_bounds = array<i64: 8, 4>}, {pipeline_mode = #tpu.pipeline_mode<synchronous>, transform_indices = @transform_2, window_bounds = array<i64: 4, 8>}, {transform_indices = @transform_3, window_bounds = array<i64: 1, 6, 8, 8>}]} {
    %c0 = arith.constant 0 : index
    %c0_0 = arith.constant 0 : index
    %c0_1 = arith.constant 0 : index
    %c0_2 = arith.constant 0 : index
    %0 = vector.load %arg1[%c0, %c0_0, %c0_1, %c0_2] : memref<1x6x4x4xbf16, #tpu.memory_space<vmem>>, vector<1x6x4x4xbf16>
    %1 = vector.shape_cast %0 : vector<1x6x4x4xbf16> to vector<6x4x4xbf16>
    %2 = arith.extf %1 : vector<6x4x4xbf16> to vector<6x4x4xf32>
    %c0_3 = arith.constant 0 : index
    %c0_4 = arith.constant 0 : index
    %3 = vector.load %arg2[%c0_3, %c0_4] : memref<8x4xf32, #tpu.memory_space<vmem>>, vector<8x4xf32>
    %c0_5 = arith.constant 0 : index
    %c0_6 = arith.constant 0 : index
    %4 = vector.load %arg3[%c0_5, %c0_6] : memref<4x8xf32, #tpu.memory_space<vmem>>, vector<4x8xf32>
    %cst = arith.constant 0.000000e+00 : f32
    %5 = vector.broadcast %cst : f32 to vector<6x8x4xf32>
    %6 = vector.extract_strided_slice %3 {offsets = [0, 0], sizes = [8, 1], strides = [1, 1]} : vector<8x4xf32> to vector<8x1xf32>
    %7 = vector.shape_cast %6 : vector<8x1xf32> to vector<1x8x1xf32>
    %8 = vector.extract_strided_slice %2 {offsets = [0, 0, 0], sizes = [6, 1, 4], strides = [1, 1, 1]} : vector<6x4x4xf32> to vector<6x1x4xf32>
    %9 = vector.broadcast %7 : vector<1x8x1xf32> to vector<6x8x4xf32>
    %10 = vector.broadcast %8 : vector<6x1x4xf32> to vector<6x8x4xf32>
    %11 = arith.mulf %9, %10 : vector<6x8x4xf32>
    %12 = arith.addf %5, %11 : vector<6x8x4xf32>
    %13 = vector.extract_strided_slice %3 {offsets = [0, 1], sizes = [8, 1], strides = [1, 1]} : vector<8x4xf32> to vector<8x1xf32>
    %14 = vector.shape_cast %13 : vector<8x1xf32> to vector<1x8x1xf32>
    %15 = vector.extract_strided_slice %2 {offsets = [0, 1, 0], sizes = [6, 1, 4], strides = [1, 1, 1]} : vector<6x4x4xf32> to vector<6x1x4xf32>
    %16 = vector.broadcast %14 : vector<1x8x1xf32> to vector<6x8x4xf32>
    %17 = vector.broadcast %15 : vector<6x1x4xf32> to vector<6x8x4xf32>
    %18 = arith.mulf %16, %17 : vector<6x8x4xf32>
    %19 = arith.addf %12, %18 : vector<6x8x4xf32>
    %20 = vector.extract_strided_slice %3 {offsets = [0, 2], sizes = [8, 1], strides = [1, 1]} : vector<8x4xf32> to vector<8x1xf32>
    %21 = vector.shape_cast %20 : vector<8x1xf32> to vector<1x8x1xf32>
    %22 = vector.extract_strided_slice %2 {offsets = [0, 2, 0], sizes = [6, 1, 4], strides = [1, 1, 1]} : vector<6x4x4xf32> to vector<6x1x4xf32>
    %23 = vector.broadcast %21 : vector<1x8x1xf32> to vector<6x8x4xf32>
    %24 = vector.broadcast %22 : vector<6x1x4xf32> to vector<6x8x4xf32>
    %25 = arith.mulf %23, %24 : vector<6x8x4xf32>
    %26 = arith.addf %19, %25 : vector<6x8x4xf32>
    %27 = vector.extract_strided_slice %3 {offsets = [0, 3], sizes = [8, 1], strides = [1, 1]} : vector<8x4xf32> to vector<8x1xf32>
    %28 = vector.shape_cast %27 : vector<8x1xf32> to vector<1x8x1xf32>
    %29 = vector.extract_strided_slice %2 {offsets = [0, 3, 0], sizes = [6, 1, 4], strides = [1, 1, 1]} : vector<6x4x4xf32> to vector<6x1x4xf32>
    %30 = vector.broadcast %28 : vector<1x8x1xf32> to vector<6x8x4xf32>
    %31 = vector.broadcast %29 : vector<6x1x4xf32> to vector<6x8x4xf32>
    %32 = arith.mulf %30, %31 : vector<6x8x4xf32>
    %33 = arith.addf %26, %32 : vector<6x8x4xf32>
    %cst_7 = arith.constant 0.000000e+00 : f32
    %34 = vector.broadcast %cst_7 : f32 to vector<6x8x8xf32>
    %35 = vector.extract_strided_slice %4 {offsets = [0, 0], sizes = [1, 8], strides = [1, 1]} : vector<4x8xf32> to vector<1x8xf32>
    %36 = vector.shape_cast %35 : vector<1x8xf32> to vector<1x1x8xf32>
    %37 = vector.extract_strided_slice %33 {offsets = [0, 0, 0], sizes = [6, 8, 1], strides = [1, 1, 1]} : vector<6x8x4xf32> to vector<6x8x1xf32>
    %38 = vector.broadcast %36 : vector<1x1x8xf32> to vector<6x8x8xf32>
    %39 = vector.broadcast %37 : vector<6x8x1xf32> to vector<6x8x8xf32>
    %40 = arith.mulf %38, %39 : vector<6x8x8xf32>
    %41 = arith.addf %34, %40 : vector<6x8x8xf32>
    %42 = vector.extract_strided_slice %4 {offsets = [1, 0], sizes = [1, 8], strides = [1, 1]} : vector<4x8xf32> to vector<1x8xf32>
    %43 = vector.shape_cast %42 : vector<1x8xf32> to vector<1x1x8xf32>
    %44 = vector.extract_strided_slice %33 {offsets = [0, 0, 1], sizes = [6, 8, 1], strides = [1, 1, 1]} : vector<6x8x4xf32> to vector<6x8x1xf32>
    %45 = vector.broadcast %43 : vector<1x1x8xf32> to vector<6x8x8xf32>
    %46 = vector.broadcast %44 : vector<6x8x1xf32> to vector<6x8x8xf32>
    %47 = arith.mulf %45, %46 : vector<6x8x8xf32>
    %48 = arith.addf %41, %47 : vector<6x8x8xf32>
    %49 = vector.extract_strided_slice %4 {offsets = [2, 0], sizes = [1, 8], strides = [1, 1]} : vector<4x8xf32> to vector<1x8xf32>
    %50 = vector.shape_cast %49 : vector<1x8xf32> to vector<1x1x8xf32>
    %51 = vector.extract_strided_slice %33 {offsets = [0, 0, 2], sizes = [6, 8, 1], strides = [1, 1, 1]} : vector<6x8x4xf32> to vector<6x8x1xf32>
    %52 = vector.broadcast %50 : vector<1x1x8xf32> to vector<6x8x8xf32>
    %53 = vector.broadcast %51 : vector<6x8x1xf32> to vector<6x8x8xf32>
    %54 = arith.mulf %52, %53 : vector<6x8x8xf32>
    %55 = arith.addf %48, %54 : vector<6x8x8xf32>
    %56 = vector.extract_strided_slice %4 {offsets = [3, 0], sizes = [1, 8], strides = [1, 1]} : vector<4x8xf32> to vector<1x8xf32>
    %57 = vector.shape_cast %56 : vector<1x8xf32> to vector<1x1x8xf32>
    %58 = vector.extract_strided_slice %33 {offsets = [0, 0, 3], sizes = [6, 8, 1], strides = [1, 1, 1]} : vector<6x8x4xf32> to vector<6x8x1xf32>
    %59 = vector.broadcast %57 : vector<1x1x8xf32> to vector<6x8x8xf32>
    %60 = vector.broadcast %58 : vector<6x8x1xf32> to vector<6x8x8xf32>
    %61 = arith.mulf %59, %60 : vector<6x8x8xf32>
    %62 = arith.addf %55, %61 : vector<6x8x8xf32>
    %c0_8 = arith.constant 0 : index
    %c0_9 = arith.constant 0 : index
    %c0_10 = arith.constant 0 : index
    %c0_11 = arith.constant 0 : index
    %63 = vector.load %arg4[%c0_8, %c0_9, %c0_10, %c0_11] : memref<1x6x8x8xf32, #tpu.memory_space<vmem>>, vector<1x6x8x8xf32>
    %64 = vector.shape_cast %63 : vector<1x6x8x8xf32> to vector<6x8x8xf32>
    %65 = vector.shape_cast %62 : vector<6x8x8xf32> to vector<1x6x8x8xf32>
    tpu.vector_store %arg4[%c0_8, %c0_9, %c0_10, %c0_11], %65 {strides = array<i32>} : memref<1x6x8x8xf32, #tpu.memory_space<vmem>>, vector<1x6x8x8xf32>,
    return
  }
  func.func @transform_0(%arg0: i32) -> (i32, i32, i32, i32) {
    %c0_i32 = arith.constant 0 : i32
    %c0_i32_0 = arith.constant 0 : i32
    %c0_i32_1 = arith.constant 0 : i32
    %c0_i32_2 = arith.constant 0 : i32
    return %arg0, %c0_i32, %c0_i32_0, %c0_i32_1 : i32, i32, i32, i32
  }
  func.func @transform_1(%arg0: i32) -> (i32, i32) {
    %c0_i32 = arith.constant 0 : i32
    %c0_i32_0 = arith.constant 0 : i32
    %c0_i32_1 = arith.constant 0 : i32
    return %c0_i32, %c0_i32_0 : i32, i32
  }
  func.func @transform_2(%arg0: i32) -> (i32, i32) {
    %c0_i32 = arith.constant 0 : i32
    %c0_i32_0 = arith.constant 0 : i32
    %c0_i32_1 = arith.constant 0 : i32
    return %c0_i32, %c0_i32_0 : i32, i32
  }
  func.func @transform_3(%arg0: i32) -> (i32, i32, i32, i32) {
    %c0_i32 = arith.constant 0 : i32
    %c0_i32_0 = arith.constant 0 : i32
    %c0_i32_1 = arith.constant 0 : i32
    %c0_i32_2 = arith.constant 0 : i32
    return %arg0, %c0_i32, %c0_i32_0, %c0_i32_1 : i32, i32, i32, i32
  }
}

</mosaic_0001>

<bundles_post_ra>
// kernel: ddn_forward.7
= control target key start
LH: loop header
LB: loop body
LE: loop exit
PB: predicated region body
PF: predicated region fallthrough
CT: control target
= control target key end

     0   :  { %vm123_vm0 = vcmask 1041408   ;;  %vm98_vm1 = vcmask 293888   ;;  %vm304_vm2 = vcmask 60416   ;;  %s575_s1 = inlined_call_operand.vmem [shape: bf16[36,8], index: 1, kind: input, shape index: {}]   ;;  %s576_s0 = inlined_call_operand.vmem [shape: bf16[128,36], index: 0, kind: input, shape index: {}]   ;;  %s577_s2 = inlined_call_operand.vmem [shape: f32[1,8], index: 2, kind: input, shape index: {}]   ;;  %s578_s3 = inlined_call_operand.vmem [shape: bf16[128,8], index: 3, kind: output, shape index: {}]  }
   0x1   :  { %v418_v0 = vld [vmem:[%s575_s1 + $0x10] ss:$0 sps:$4 sm:$0x33]   ;;  %v419_v1 = vld [vmem:[%s575_s1 + $0x8] sm:$0xff]   ;;  %v420_v3 = vld [vmem:[%s575_s1] sm:$0xff]  }
   0x2   :  { %416 = vmatprep.subr.msk.bf16.mxu0 %vm123_vm0, %v418_v0  ;;  %417 = vmatprep.subr.msk.bf16.mxu1 %vm123_vm0, %v418_v0  ;;  %v125_v2 = vsel %vm123_vm0, %v418_v0, 0  ;;  %v421_v4 = vld [vmem:[%s576_s0] sm:$0xff]   ;;  %v423_v6 = vld [vmem:[%s576_s0 + $0x8] sm:$0xff]   ;;  %v425_v8 = vld [vmem:[%s576_s0 + $0x10] sm:$0xff]  }
   0x3   :  { %389 = vmatpush3.bf16.msra.mxu0 %v125_v2  ;;  %413 = vmatpush3.bf16.msra.mxu1 %v125_v2  ;;  %v422_v5 = vld [vmem:[%s576_s0 + $0x20] sm:$0xff]   ;;  %v424_v7 = vld [vmem:[%s576_s0 + $0x28] sm:$0xff]   ;;  %v426_v9 = vld [vmem:[%s576_s0 + $0x30] sm:$0xff]  }
   0x4   :  { %390 = vmatprep.subr.bf16.mxu0 %v419_v1  ;;  %411 = vmatprep.subr.bf16.mxu1 %v419_v1  ;;  %v427_v10 = vld [vmem:[%s576_s0 + $0x18] sm:$0xff]   ;;  %v493_v12 = vld [vmem:[%s577_s2] ss:$0 sm:$0xff] }
   0x5   :  { %394 = vmatprep.mubr.msk.bf16.mxu0 %vm98_vm1, %v421_v4  ;;  %402 = vmatprep.mubr.msk.bf16.mxu1 %vm98_vm1, %v422_v5  ;;  %v428_v11 = vld [vmem:[%s576_s0 + $0x38] sm:$0xff]  }
   0x7   :  { %391 = vmatpush3.bf16.msra.mxu0 %v419_v1  ;;  %414 = vmatpush3.bf16.msra.mxu1 %v419_v1 }
   0x8   :  { %392 = vmatprep.subr.bf16.mxu0 %v420_v3  ;;  %412 = vmatprep.subr.bf16.mxu1 %v420_v3 }
   0xb   :  { %393 = vmatpush3.bf16.msra.mxu0 %v420_v3  ;;  %415 = vmatpush3.bf16.msra.mxu1 %v420_v3 }
   0xe   :  { %395 = vmatmul.mubr.msk.bf16.vlgmr.msra.gmra.mxu0 %vm98_vm1, %v423_v6  ;;  %403 = vmatmul.mubr.msk.bf16.vlgmr.msra.gmra.mxu1 %vm98_vm1, %v424_v7 }
   0xf   :  { %398 = vmatprep.mubr.msk.bf16.mxu0 %vm98_vm1, %v425_v8  ;;  %406 = vmatprep.mubr.msk.bf16.mxu1 %vm98_vm1, %v426_v9 }
  0x16   :  { %399 = vmatmul.mubr.msk.bf16.gmra.mxu0 %vm98_vm1, %v427_v10  ;;  %407 = vmatmul.mubr.msk.bf16.gmra.mxu1 %vm98_vm1, %v428_v11 }
  0xce   :  { %v396_v13 = vpop.f32.mrf.mxu0  ;;  %v404_v14 = vpop.f32.mrf.mxu1 }
  0xcf   :  { %v170_v15 = vadd.f32 %v396_v13, %v493_v12  ;;  %v202_v16 = vadd.f32 %v404_v14, %v493_v12 }
  0xd0   :  { %v161_v17 = vpop.f32.mrf.mxu0  ;;  %v193_v18 = vpop.f32.mrf.mxu1 }
  0xd1   :  { %v226_v19 = vmax.f32 %v170_v15, 0.0  ;;  %v234_v20 = vmax.f32 %v202_v16, 0.0  ;;  %v162_v21 = vadd.f32 %v493_v12, %v161_v17  ;;  %v194_v22 = vadd.f32 %v493_v12, %v193_v18 }
  0xd2   :  { %v397_v23 = vpop.f32.mrf.mxu0  ;;  %v405_v24 = vpop.f32.mrf.mxu1 }
  0xd3   :  { %v363_v25 = vpack.c.bf16 %v226_v19, %v226_v19  ;;  %v371_v26 = vpack.c.bf16 %v234_v20, %v234_v20  ;;  %v224_v27 = vmax.f32 %v162_v21, 0.0  ;;  %v232_v28 = vmax.f32 %v194_v22, 0.0 }
  0xd4   :  { %v173_v29 = vadd.f32 %v397_v23, %v493_v12  ;;  %v205_v30 = vadd.f32 %v405_v24, %v493_v12  ;;  %v164_v31 = vpop.f32.mrf.mxu0  ;;  %v196_v32 = vpop.f32.mrf.mxu1 }
  0xd5   :  { %307 = vst.msk [vmem:[%s578_s3 + $0x8] sm:$0xf] %vm304_vm2, %v363_v25  ;;  %315 = vst.msk [vmem:[%s578_s3 + $0x28] sm:$0xf] %vm304_vm2, %v371_v26  ;;  %v361_v33 = vpack.c.bf16 %v224_v27, %v224_v27  ;;  %v369_v34 = vpack.c.bf16 %v232_v28, %v232_v28  ;;  %v165_v35 = vadd.f32 %v493_v12, %v164_v31 }
  0xd6   :  { %v197_v36 = vadd.f32 %v493_v12, %v196_v32  ;;  %v227_v37 = vmax.f32 %v173_v29, 0.0  ;;  %v235_v38 = vmax.f32 %v205_v30, 0.0  ;;  %v400_v39 = vpop.f32.mrf.mxu0  ;;  %v408_v40 = vpop.f32.mrf.mxu1 }
  0xd7   :  { %305 = vst.msk [vmem:[%s578_s3] sm:$0xf] %vm304_vm2, %v361_v33  ;;  %313 = vst.msk [vmem:[%s578_s3 + $0x20] sm:$0xf] %vm304_vm2, %v369_v34  ;;  %v225_v41 = vmax.f32 %v165_v35, 0.0  ;;  %v186_v43 = vadd.f32 %v400_v39, %v493_v12  ;;  %v218_v44 = vadd.f32 %v408_v40, %v493_v12 }
  0xd8   :  { %v233_v42 = vmax.f32 %v197_v36, 0.0  ;;  %v364_v45 = vpack.c.bf16 %v227_v37, %v227_v37  ;;  %v372_v46 = vpack.c.bf16 %v235_v38, %v235_v38  ;;  %v177_v47 = vpop.f32.mrf.mxu0  ;;  %v209_v48 = vpop.f32.mrf.mxu1 }
  0xd9   :  { %v362_v49 = vpack.c.bf16 %v225_v41, %v225_v41  ;;  %v230_v51 = vmax.f32 %v186_v43, 0.0  ;;  %v238_v52 = vmax.f32 %v218_v44, 0.0  ;;  %v178_v53 = vadd.f32 %v493_v12, %v177_v47 }
  0xda   :  { %v370_v50 = vpack.c.bf16 %v233_v42, %v233_v42  ;;  %308 = vst.msk [vmem:[%s578_s3 + $0xc] sm:$0xf] %vm304_vm2, %v364_v45  ;;  %316 = vst.msk [vmem:[%s578_s3 + $0x2c] sm:$0xf] %vm304_vm2, %v372_v46  ;;  %v210_v54 = vadd.f32 %v493_v12, %v209_v48  ;;  %v401_v55 = vpop.f32.mrf.mxu0  ;;  %v409_v56 = vpop.f32.mrf.mxu1 }
  0xdb   :  { %306 = vst.msk [vmem:[%s578_s3 + $0x4] sm:$0xf] %vm304_vm2, %v362_v49  ;;  %v367_v57 = vpack.c.bf16 %v230_v51, %v230_v51  ;;  %v375_v58 = vpack.c.bf16 %v238_v52, %v238_v52  ;;  %v189_v59 = vadd.f32 %v401_v55, %v493_v12  ;;  %v221_v60 = vadd.f32 %v409_v56, %v493_v12 }
  0xdc   :  { %314 = vst.msk [vmem:[%s578_s3 + $0x24] sm:$0xf] %vm304_vm2, %v370_v50  ;;  %v228_v61 = vmax.f32 %v178_v53, 0.0  ;;  %v236_v62 = vmax.f32 %v210_v54, 0.0  ;;  %v180_v63 = vpop.f32.mrf.mxu0  ;;  %v212_v0 = vpop.f32.mrf.mxu1 }
  0xdd   :  { %311 = vst.msk [vmem:[%s578_s3 + $0x18] sm:$0xf] %vm304_vm2, %v367_v57  ;;  %319 = vst.msk [vmem:[%s578_s3 + $0x38] sm:$0xf] %vm304_vm2, %v375_v58  ;;  %v231_v1 = vmax.f32 %v189_v59, 0.0  ;;  %v239_v2 = vmax.f32 %v221_v60, 0.0  ;;  %v181_v3 = vadd.f32 %v493_v12, %v180_v63  ;;  %v213_v4 = vadd.f32 %v493_v12, %v212_v0 }
  0xde   :  { %v365_v5 = vpack.c.bf16 %v228_v61, %v228_v61  ;;  %v373_v6 = vpack.c.bf16 %v236_v62, %v236_v62 }
  0xdf   :  { %v368_v7 = vpack.c.bf16 %v231_v1, %v231_v1  ;;  %v376_v8 = vpack.c.bf16 %v239_v2, %v239_v2  ;;  %v229_v9 = vmax.f32 %v181_v3, 0.0  ;;  %v237_v10 = vmax.f32 %v213_v4, 0.0 }
  0xe0   :  { %309 = vst.msk [vmem:[%s578_s3 + $0x10] sm:$0xf] %vm304_vm2, %v365_v5  ;;  %317 = vst.msk [vmem:[%s578_s3 + $0x30] sm:$0xf] %vm304_vm2, %v373_v6 }
  0xe1   :  { %312 = vst.msk [vmem:[%s578_s3 + $0x1c] sm:$0xf] %vm304_vm2, %v368_v7  ;;  %320 = vst.msk [vmem:[%s578_s3 + $0x3c] sm:$0xf] %vm304_vm2, %v376_v8  ;;  %v366_v11 = vpack.c.bf16 %v229_v9, %v229_v9  ;;  %v374_v12 = vpack.c.bf16 %v237_v10, %v237_v10 }
  0xe3   :  { %310 = vst.msk [vmem:[%s578_s3 + $0x14] sm:$0xf] %vm304_vm2, %v366_v11  ;;  %318 = vst.msk [vmem:[%s578_s3 + $0x34] sm:$0xf] %vm304_vm2, %v374_v12 }

// kernel: ddn_forward.8
= control target key start
LH: loop header
LB: loop body
LE: loop exit
PB: predicated region body
PF: predicated region fallthrough
CT: control target
= control target key end

     0   :  { %vm79_vm0 = vcmask 1043456   ;;  %vm72_vm1 = vcmask 588800   ;;  %vm152_vm2 = vcmask 125952   ;;  %s264_s1 = inlined_call_operand.vmem [shape: bf16[72,16], index: 1, kind: input, shape index: {}]   ;;  %s265_s0 = inlined_call_operand.vmem [shape: bf16[32,72], index: 0, kind: input, shape index: {}]   ;;  %s266_s2 = inlined_call_operand.vmem [shape: f32[1,16], index: 2, kind: input, shape index: {}]   ;;  %s267_s3 = inlined_call_operand.vmem [shape: bf16[32,16], index: 3, kind: output, shape index: {}]  }
   0x1   :  { %v201_v0 = vld [vmem:[%s264_s1 + $0x20] ss:$0 sps:$4 sm:$0xff]   ;;  %v202_v1 = vld [vmem:[%s264_s1 + $0x18] sm:$0xff]   ;;  %v203_v3 = vld [vmem:[%s264_s1 + $0x10] sm:$0xff]  }
   0x2   :  { %200 = vmatprep.subr.msk.bf16.mxu0 %vm79_vm0, %v201_v0  ;;  %v81_v2 = vsel %vm79_vm0, %v201_v0, 0  ;;  %v206_v4 = vld [vmem:[%s265_s0] sm:$0xff]   ;;  %v204_v5 = vld [vmem:[%s264_s1 + $0x8] sm:$0xff]  }
   0x3   :  { %187 = vmatpush3.bf16.msra.mxu0 %v81_v2  ;;  %196 = vmatprep.mubr.msk.bf16.mxu0 %vm72_vm1, %v206_v4  ;;  %v205_v6 = vld [vmem:[%s264_s1] sm:$0xff]   ;;  %v207_v7 = vld [vmem:[%s265_s0 + $0x8] sm:$0xff]  }
   0x4   :  { %188 = vmatprep.subr.bf16.mxu0 %v202_v1  ;;  %v161_v8 = vld [vmem:[%s266_s2] ss:$0 sm:$0xff] }
   0x7   :  { %189 = vmatpush3.bf16.msra.mxu0 %v202_v1 }
   0x8   :  { %190 = vmatprep.subr.bf16.mxu0 %v203_v3 }
   0xb   :  { %191 = vmatpush3.bf16.msra.mxu0 %v203_v3 }
   0xc   :  { %192 = vmatprep.subr.bf16.mxu0 %v204_v5 }
   0xf   :  { %193 = vmatpush3.bf16.msra.mxu0 %v204_v5 }
  0x10   :  { %194 = vmatprep.subr.bf16.mxu0 %v205_v6 }
  0x13   :  { %195 = vmatpush3.bf16.msra.mxu0 %v205_v6 }
  0x16   :  { %197 = vmatmul.mubr.msk.bf16.vlgmr.msra.gmra.mxu0 %vm72_vm1, %v207_v7 }
  0xd6   :  { %v198_v9 = vpop.f32.mrf.mxu0 }
  0xd7   :  { %v126_v10 = vadd.f32 %v198_v9, %v161_v8 }
  0xd8   :  { %v117_v11 = vpop.f32.mrf.mxu0 }
  0xd9   :  { %v134_v12 = vmax.f32 %v126_v10, 0.0  ;;  %v118_v13 = vadd.f32 %v161_v8, %v117_v11 }
  0xda   :  { %v199_v14 = vpop.f32.mrf.mxu0 }
  0xdb   :  { %v177_v15 = vpack.c.bf16 %v134_v12, %v134_v12  ;;  %v132_v16 = vmax.f32 %v118_v13, 0.0  ;;  %v129_v17 = vadd.f32 %v199_v14, %v161_v8 }
  0xdc   :  { %v120_v18 = vpop.f32.mrf.mxu0 }
  0xdd   :  { %155 = vst.msk [vmem:[%s267_s3 + $0x8] sm:$0xf] %vm152_vm2, %v177_v15  ;;  %v175_v19 = vpack.c.bf16 %v132_v16, %v132_v16  ;;  %v135_v20 = vmax.f32 %v129_v17, 0.0  ;;  %v121_v21 = vadd.f32 %v161_v8, %v120_v18 }
  0xdf   :  { %153 = vst.msk [vmem:[%s267_s3] sm:$0xf] %vm152_vm2, %v175_v19  ;;  %v178_v22 = vpack.c.bf16 %v135_v20, %v135_v20  ;;  %v133_v23 = vmax.f32 %v121_v21, 0.0 }
  0xe1   :  { %156 = vst.msk [vmem:[%s267_s3 + $0xc] sm:$0xf] %vm152_vm2, %v178_v22  ;;  %v176_v24 = vpack.c.bf16 %v133_v23, %v133_v23 }
  0xe3   :  { %154 = vst.msk [vmem:[%s267_s3 + $0x4] sm:$0xf] %vm152_vm2, %v176_v24 }

// kernel: ddn_forward.10
= control target key start
LH: loop header
LB: loop body
LE: loop exit
PB: predicated region body
PF: predicated region fallthrough
CT: control target
= control target key end

     0   :  { %vm39_vm0 = vcmask 1041408   ;;  %v109_v0 = vmov 0.0   ;;  %vm110_vm1 = vmmov 0   ;;  %vm35_vm2 = vcmask 162816   ;;  %s146_s1 = inlined_call_operand.vmem [shape: bf16[20,6], index: 1, kind: input, shape index: {}]   ;;  %s147_s0 = inlined_call_operand.vmem [shape: bf16[8,20], index: 0, kind: input, shape index: {}]   ;;  %s148_s2 = inlined_call_operand.vmem [shape: f32[1,6], index: 2, kind: input, shape index: {}]   ;;  %s149_s3 = inlined_call_operand.vmem [shape: bf16[8,6], index: 3, kind: output, shape index: {}]  }
   0x1   :  { %97 = vmatprep.subr.bf16.mxu0 %v109_v0  ;;  %v107_v1 = vld [vmem:[%s146_s1 + $0x8] ss:$0 sps:$4 sm:$0x33]   ;;  %101 = vmatprep.mubr.msk.bf16.mxu0 %vm110_vm1, %v109_v0  ;;  %v108_v3 = vld [vmem:[%s146_s1] sm:$0xff]   ;;  %vm84_vm3 = vcmask 44032  }
   0x2   :  { %v41_v2 = vsel %vm39_vm0, %v107_v1, 0  ;;  %v15_v4 = vld [vmem:[%s147_s0] sm:$0xf] }
   0x3   :  { %98 = vmatpush3.bf16.msra.mxu0 %v41_v2  ;;  %v90_v5 = vld [vmem:[%s148_s2] ss:$0 sm:$0xff] }
   0x4   :  { %99 = vmatprep.subr.bf16.mxu0 %v109_v0 }
   0x7   :  { %100 = vmatpush3.bf16.msra.mxu0 %v108_v3 }
   0xa   :  { %102 = vmatmul.mubr.msk.bf16.vlgmr.msra.gmra.mxu0 %vm35_vm2, %v15_v4 }
  0xca   :  { %v77_v6 = vpop.f32.mrf.mxu0 }
  0xcb   :  { %v78_v7 = vadd.f32 %v90_v5, %v77_v6 }
  0xcc   :  { %v103_v8 = vpop.f32.mrf.mxu0 }
  0xcd   :  { %v83_v9 = vpack.c.bf16 %v78_v7, %v78_v7 }
  0xce   :  { %v80_v10 = vpop.f32.mrf.mxu0 }
  0xcf   :  { %85 = vst.msk [vmem:[%s149_s3] sm:$0xf] %vm84_vm3, %v83_v9 }
  0xd0   :  { %v104_v11 = vpop.f32.mrf.mxu0 }

// kernel: ddn_forward.9
= control target key start
LH: loop header
LB: loop body
LE: loop exit
PB: predicated region body
PF: predicated region fallthrough
CT: control target
= control target key end

     0   :  { %v178_v0 = vmov 0   ;;  %vm101_vm0 = vcmask 130048   ;;  %vm147_vm1 = vcmask 125952   ;;  %s235_s1 = inlined_call_operand.vmem [shape: bf16[144,16], index: 1, kind: input, shape index: {}]   ;;  %s236_s0 = inlined_call_operand.vmem [shape: bf16[8,144], index: 0, kind: input, shape index: {}]   ;;  %s237_s2 = inlined_call_operand.vmem [shape: f32[1,16], index: 2, kind: input, shape index: {}]   ;;  %s238_s3 = inlined_call_operand.vmem [shape: bf16[8,16], index: 3, kind: output, shape index: {}]  }
   0x1   :  { %105 = vmatprep.subr.bf16.mxu0 %v178_v0  ;;  %v167_v1 = vld [vmem:[%s235_s1 + $0x38] sm:$0xff]   ;;  %v168_v2 = vld [vmem:[%s235_s1 + $0x30] sm:$0xff]   ;;  %v169_v3 = vld [vmem:[%s235_s1 + $0x28] sm:$0xff]  }
   0x2   :  { %106 = vmatpush1.bf16.msra.mxu0 %v167_v1  ;;  %v15_v4 = vld [vmem:[%s236_s0] sm:$0xff]  ;;  %v171_v7 = vld [vmem:[%s235_s1 + $0x18] sm:$0xff]   ;;  %v172_v8 = vld [vmem:[%s235_s1 + $0x10] sm:$0xff]  }
   0x3   :  { %107 = vmatprep.subr.bf16.mxu0 %v178_v0  ;;  %v170_v5 = vld [vmem:[%s235_s1 + $0x20] sm:$0xff]   ;;  %v155_v6 = vcombine.high %v15_v4, %v15_v4  ;;  %v173_v9 = vld [vmem:[%s235_s1 + $0x8] sm:$0xff]   ;;  %v154_v12 = vcombine.low %v15_v4, %v15_v4 }
   0x4   :  { %v174_v10 = vld [vmem:[%s235_s1] sm:$0xff]  }
   0x5   :  { %165 = vmatprep.mubr.msk.bf16.mxu0 %vm101_vm0, %v155_v6  ;;  %v175_v11 = vld [vmem:[%s235_s1 + $0x40] sm:$0xff]  }
   0x6   :  { %108 = vmatpush1.bf16.msra.mxu0 %v168_v2  ;;  %v153_v13 = vld [vmem:[%s237_s2] ss:$0 sm:$0xff] }
   0x7   :  { %109 = vmatprep.subr.bf16.mxu0 %v178_v0 }
   0xa   :  { %110 = vmatpush1.bf16.msra.mxu0 %v169_v3 }
   0xb   :  { %111 = vmatprep.subr.bf16.mxu0 %v178_v0 }
   0xe   :  { %112 = vmatpush1.bf16.msra.mxu0 %v170_v5 }
   0xf   :  { %113 = vmatprep.subr.bf16.mxu0 %v178_v0 }
  0x12   :  { %114 = vmatpush1.bf16.msra.mxu0 %v171_v7 }
  0x13   :  { %115 = vmatprep.subr.bf16.mxu0 %v178_v0 }
  0x16   :  { %116 = vmatpush1.bf16.msra.mxu0 %v172_v8 }
  0x17   :  { %117 = vmatprep.subr.bf16.mxu0 %v178_v0 }
  0x1a   :  { %118 = vmatpush1.bf16.msra.mxu0 %v173_v9 }
  0x1b   :  { %119 = vmatprep.subr.bf16.mxu0 %v178_v0 }
  0x1e   :  { %120 = vmatpush1.bf16.msra.mxu0 %v174_v10 }
  0x1f   :  { %135 = vmatprep.subr.bf16.mxu0 %v178_v0 }
  0x22   :  { %136 = vmatpush2.bf16.msra.mxu0 %v175_v11 }
  0x25   :  { %138 = vmatmul.mubr.bf16.vlgmr.msra.gmra.mxu0 %v154_v12 }
  0xe5   :  { %v139_v14 = vpop.f32.mrf.mxu0 }
  0xe6   :  { %v140_v15 = vadd.f32 %v153_v13, %v139_v14 }
  0xe7   :  { %v141_v16 = vpop.f32.mrf.mxu0 }
  0xe8   :  { %v145_v17 = vmax.f32 %v140_v15, 0.0 }
  0xe9   :  { %v142_v18 = vpop.f32.mrf.mxu0 }
  0xea   :  { %v146_v19 = vpack.c.bf16 %v145_v17, %v145_v17 }
  0xeb   :  { %v143_v20 = vpop.f32.mrf.mxu0 }
  0xec   :  { %148 = vst.msk [vmem:[%s238_s3] sm:$0xf] %vm147_vm1, %v146_v19 }

// kernel: ddn_forward.12
= control target key start
LH: loop header
LB: loop body
LE: loop exit
PB: predicated region body
PF: predicated region fallthrough
CT: control target
= control target key end

     0   :  { %vm44_vm0 = vcmask 130048   ;;  %vm116_vm1 = vcmask 44032   ;;  %s195_s1 = inlined_call_operand.vmem [shape: bf16[16,6], index: 1, kind: input, shape index: {}]   ;;  %s196_s0 = inlined_call_operand.vmem [shape: bf16[32,16], index: 0, kind: input, shape index: {}]   ;;  %s197_s2 = inlined_call_operand.vmem [shape: f32[1,6], index: 2, kind: input, shape index: {}]   ;;  %s198_s3 = inlined_call_operand.vmem [shape: bf16[32,6], index: 3, kind: output, shape index: {}]  }
   0x1   :  { %v148_v0 = vld [vmem:[%s195_s1] sm:$0xff]   ;;  %v150_v2 = vld [vmem:[%s196_s0 + $0x8] sm:$0xff]  }
   0x2   :  { %v149_v1 = vld [vmem:[%s196_s0] sm:$0xff]   ;;  %142 = vmatprep.subr.bf16.mxu0 %v148_v0 }
   0x3   :  { %143 = vmatpush3.bf16.msra.mxu0 %v148_v0  ;;  %144 = vmatprep.mubr.msk.bf16.mxu0 %vm44_vm0, %v149_v1  ;;  %v125_v3 = vld [vmem:[%s197_s2] ss:$0 sm:$0xff] }
   0x6   :  { %145 = vmatmul.mubr.msk.bf16.vlgmr.msra.gmra.mxu0 %vm44_vm0, %v150_v2 }
  0xc6   :  { %v146_v4 = vpop.f32.mrf.mxu0 }
  0xc7   :  { %v94_v5 = vadd.f32 %v146_v4, %v125_v3 }
  0xc8   :  { %v85_v6 = vpop.f32.mrf.mxu0 }
  0xc9   :  { %v137_v7 = vpack.c.bf16 %v94_v5, %v94_v5  ;;  %v86_v8 = vadd.f32 %v125_v3, %v85_v6 }
  0xca   :  { %v147_v9 = vpop.f32.mrf.mxu0 }
  0xcb   :  { %119 = vst.msk [vmem:[%s198_s3 + $0x8] sm:$0xf] %vm116_vm1, %v137_v7  ;;  %v135_v10 = vpack.c.bf16 %v86_v8, %v86_v8  ;;  %v97_v11 = vadd.f32 %v147_v9, %v125_v3 }
  0xcc   :  { %v88_v12 = vpop.f32.mrf.mxu0 }
  0xcd   :  { %117 = vst.msk [vmem:[%s198_s3] sm:$0xf] %vm116_vm1, %v135_v10  ;;  %v138_v13 = vpack.c.bf16 %v97_v11, %v97_v11  ;;  %v89_v14 = vadd.f32 %v125_v3, %v88_v12 }
  0xcf   :  { %120 = vst.msk [vmem:[%s198_s3 + $0xc] sm:$0xf] %vm116_vm1, %v138_v13  ;;  %v136_v15 = vpack.c.bf16 %v89_v14, %v89_v14 }
  0xd1   :  { %118 = vst.msk [vmem:[%s198_s3 + $0x4] sm:$0xf] %vm116_vm1, %v136_v15 }

// kernel: ddn_forward.11
= control target key start
LH: loop header
LB: loop body
LE: loop exit
PB: predicated region body
PF: predicated region fallthrough
CT: control target
= control target key end

     0   :  { %8 = vsyncpa [#allocation3], 0  ;;  %s706_s0 = inlined_call_operand.vmem [shape: bf16[2,6,2,2], index: 0, kind: input, shape index: {}]   ;;  %s707_s1 = inlined_call_operand.vmem [shape: f32[8,2], index: 1, kind: input, shape index: {}]   ;;  %s708_s2 = inlined_call_operand.vmem [shape: f32[2,8], index: 2, kind: input, shape index: {}]   ;;  %s709_s3 = inlined_call_operand.hbm [shape: f32[2,6,8,8], index: 3, kind: output, shape index: {}]  }
   0x1   :  { %10 = vsyncpa [#allocation3 + $0x1], 0  ;;  %s576_s12 = smov 0   ;;  %s578_s13 = smov 0  }
   0x2   :  { %s580_s14 = smov 0   ;;  %s582_s15 = smov 0  }
   0x3 LB: > { %s597_s16 = sadd.s32 4294967295, %s549_s15   ;;  %s430_s17 = sadd.s32 4294967294, %s549_s15   ;;  %s549_s15 = sphi %s582_s15, %s715_s15   ;;  %s545_s14 = sphi %s580_s14, %s714_s14   ;;  %s541_s13 = sphi %s578_s13, %s713_s13   ;;  %s537_s12 = sphi %s576_s12, %s712_s12  }
   0x4   : > { %s601_s18 = sadd.s32 1, %s549_s15   ;;  %s91_s19 = sadd.s32 1, %s545_s14 }
   0x5   : > { %s88_s20 = ssub.s32 %s549_s15, %s601_s18  ;;  %p101_p0 = scmp.ne.s32.totalorder %s545_s14, %s541_s13 }
   0x6   : > { %p89_p1 = scmp.eq.s32.totalorder %s88_s20, 0  ;;  %p102_p2 = scmp.eq.s32.totalorder %s597_s16, 1 }
   0x7   : > { %p107_p3 = scmp.ne.s32.totalorder %s541_s13, %s537_s12  ;;  %p108_p4 = scmp.eq.s32.totalorder %s430_s17, 1 }
   0x8   : > { %s612_s21 = scalar_select %p89_p1, %s545_s14, %s91_s19  }
   0x9   : > { %p614_p5 = por %p102_p2, %p101_p0  ;;  %p618_p6 = por %p108_p4, %p107_p3 }
   0xa   : > { %p433_p7 = scmp.ge.s32.totalorder %s549_s15, 1  ;;  %p139_p8 = scmp.lt.s32.totalorder %s549_s15, 3 }
   0xc   : > { %p140_p9 = pnand %p433_p7, %p139_p8 }
   0xd   : > { %p162_p10 = scmp.lt.s32.totalorder (!%p140_p9), %s597_s16, 1  ;;  %s159_s6 = sand.u32 (!%p140_p9), 1, %s541_s13  }
   0xe   : > { %143 = sbr.rel (%p140_p9) target bundleno = 325 (0x145), region = 32  ;;  %s553_s24 = smov (!%p140_p9), [#allocation2]  }
   0xf   : > { %s437_s7 = smul.u32 (!%p140_p9), 48, %s159_s6  ;;  %s493_s25 = sshll.u32 (!%p140_p9), %s553_s24, 4  ;;  %s494_s25 = int_to_ptr.vmem [resolvable:$false] %s493_s25 }
  0x10   : > { %s439_s9 = smul.u32 (!%p140_p9), 768, %s597_s16 }
  0x11   : > { %s641_s8 = scalar_lea.vmem (!%p140_p9), [#allocation2], %s437_s7 }
  0x12   : > { %s368_s10 = sshll.u32 (!%p140_p9), %s641_s8, 4  ;;  %s658_s19 = scalar_lea.hbm (!%p140_p9), %s709_s3, %s439_s9  ;;  %s660_s10 = int_to_ptr.vmem [resolvable:$true] %s368_s10 }
  0x13   : > { %v178_v0 = vld [vmem:[%s707_s1] sm:$0xff]  ;;  %v551_v1 = vmov 0   ;;  %v552_v2 = vmov 1   ;;  %s163_s26 = scalar_select %p162_p10, %s597_s16, 1  ;;  %v185_v3 = vlaneseq  ;;  %vm347_vm0 = vcmask 64512  }
  0x14   : > { %483 = vset.pattern.permute.xlu0 %v551_v1  ;;  %485 = vset.pattern.permute.xlu1 %v551_v1  ;;  %v179_v51 = vld [vmem:[%s708_s2] sm:$0x3]  ;;  %s666_s16 = scalar_lea.sflag [#allocation3], %s159_s6  ;;  %s489_s20 = scalar_lea.vmem %s660_s10, 768 }
  0x15   : > { %182 = vperm.xlu0 %483, %v178_v0   ;;  %s438_s27 = smul.u32 6, %s163_s26  ;;  %v186_v4 = vshrl.u32 %v185_v3, 7  ;;  %p490_p11 = scmp.ne.s32.totalorder %s660_s10, %s489_s20 }
  0x16   : > { %s495_s26 = scalar_lea.vmem %s494_s25, 1536  ;;  %p496_p0 = scmp.lt.s32.totalorder %s660_s10, %s494_s25 }
  0x17   : > { %s165_s30 = scalar_lea.vmem %s706_s0, %s438_s27  ;;  %v187_v8 = vsub.s32 0, %v186_v4  ;;  %v227_v9 = vsub.s32 1, %v186_v4  ;;  %p491_p12 = pnand %p490_p11, %p614_p5 }
  0x18   : > { %v169_v5 = vld [vmem:[%s165_s30 + $0x3] sm:$0x1]  ;;  %v166_v6 = vld [vmem:[%s165_s30] sm:$0x1]  ;;  %v167_v11 = vld [vmem:[%s165_s30 + $0x1] sm:$0x1]  ;;  %p497_p1 = scmp.lt.s32.totalorder %s495_s26, %s489_s20 }
  0x19   : > { %484 = vset.pattern.permute.xlu0 %v552_v2  ;;  %v175_v7 = vunpack.c.l.bf16 %v169_v5  ;;  %v172_v10 = vunpack.c.l.bf16 %v166_v6  ;;  %v173_v13 = vunpack.c.l.bf16 %v167_v11  ;;  %v168_v18 = vld [vmem:[%s165_s30 + $0x2] sm:$0x1]  ;;  %v170_v27 = vld [vmem:[%s165_s30 + $0x4] sm:$0x1]  ;;  %v171_v32 = vld [vmem:[%s165_s30 + $0x5] sm:$0x1]  ;;  %v264_v54 = vrot.slane %v179_v51, %v187_v8  ;;  %p492_p13 = pneg %p491_p12 }
  0x1a   : > { %222 = vperm.xlu0 %484, %v178_v0   ;;  %v174_v22 = vunpack.c.l.bf16 %v168_v18  ;;  %v176_v35 = vunpack.c.l.bf16 %v170_v27  ;;  %v177_v36 = vunpack.c.l.bf16 %v171_v32  ;;  %v310_v55 = vrot.slane %v179_v51, %v227_v9  ;;  %p498_p2 = por %p497_p1, %p496_p0 }
  0x1b   : > { %v200_v14 = vrot.slane %v175_v7, %v187_v8  ;;  %v240_v15 = vrot.slane %v175_v7, %v227_v9  ;;  %v188_v16 = vrot.slane %v172_v10, %v187_v8  ;;  %v228_v17 = vrot.slane %v172_v10, %v227_v9 }
  0x1c   : > { %v232_v19 = vrot.slane %v173_v13, %v227_v9  ;;  %v192_v21 = vrot.slane %v173_v13, %v187_v8  ;;  %v236_v31 = vrot.slane %v174_v22, %v227_v9  ;;  %v196_v34 = vrot.slane %v174_v22, %v187_v8  ;;  %p499_p3 = pnand %p498_p2, %p492_p13 }
  0x1d   : > { %v244_v39 = vrot.slane %v176_v35, %v227_v9  ;;  %v248_v40 = vrot.slane %v177_v36, %v227_v9  ;;  %v204_v42 = vrot.slane %v176_v35, %v187_v8  ;;  %v208_v43 = vrot.slane %v177_v36, %v187_v8 }
  0x1e   : > { %486 = vset.pattern.permute.xlu0 %v551_v1 }
  0x90   : > { %v183_v12 = vpop.permute.xlu0 %182 }
  0x91   : > { %v212_v23 = vmul.f32 %v200_v14, %v183_v12  ;;  %v209_v25 = vmul.f32 %v188_v16, %v183_v12  ;;  %v210_v33 = vmul.f32 %v192_v21, %v183_v12  ;;  %v211_v41 = vmul.f32 %v196_v34, %v183_v12 }
  0x92   : > { %v213_v47 = vmul.f32 %v204_v42, %v183_v12  ;;  %v214_v48 = vmul.f32 %v208_v43, %v183_v12 }
  0x95   : > { %v223_v20 = vpop.permute.xlu0 %222 }
  0x96   : > { %v252_v24 = vmul.f32 %v240_v15, %v223_v20  ;;  %v249_v26 = vmul.f32 %v228_v17, %v223_v20  ;;  %v250_v30 = vmul.f32 %v232_v19, %v223_v20  ;;  %v251_v38 = vmul.f32 %v236_v31, %v223_v20 }
  0x97   : > { %v253_v45 = vmul.f32 %v244_v39, %v223_v20  ;;  %v254_v46 = vmul.f32 %v248_v40, %v223_v20 }
  0x98   : > { %v258_v28 = vadd.f32 %v252_v24, %v212_v23  ;;  %v255_v29 = vadd.f32 %v249_v26, %v209_v25  ;;  %v256_v37 = vadd.f32 %v250_v30, %v210_v33  ;;  %v257_v44 = vadd.f32 %v251_v38, %v211_v41 }
  0x99   : > { %v259_v49 = vadd.f32 %v253_v45, %v213_v47  ;;  %v260_v50 = vadd.f32 %v254_v46, %v214_v48 }
  0x9a   : > { %282 = vperm.xlu0 %486, %v258_v28   ;;  %267 = vperm.xlu1 %485, %v255_v29  }
  0x9e   : > { %487 = vset.pattern.permute.xlu0 %v552_v2  ;;  %272 = vperm.xlu1 %485, %v256_v37  }
  0x9f   : > { %312 = vperm.xlu0 %487, %v255_v29  }
  0xa2   : > { %277 = vperm.xlu1 %485, %v257_v44  }
  0xa3   : > { %324 = vperm.xlu0 %487, %v258_v28  }
  0xa6   : > { %287 = vperm.xlu1 %485, %v259_v49  }
  0xa7   : > { %332 = vperm.xlu0 %487, %v260_v50  }
  0xaa   : > { %292 = vperm.xlu1 %485, %v260_v50  }
  0xae   : > { %488 = vset.pattern.permute.xlu1 %v552_v2 }
  0xaf   : > { %316 = vperm.xlu1 %488, %v256_v37  }
  0xb3   : > { %320 = vperm.xlu1 %488, %v257_v44  }
  0xb7   : > { %328 = vperm.xlu1 %488, %v259_v49  }
 0x115   : > { %v283_v52 = vpop.permute.xlu0 %282  ;;  %v268_v53 = vpop.permute.xlu1 %267 }
 0x116   : > { %v295_v58 = vmul.f32 %v268_v53, %v264_v54  ;;  %v298_v63 = vmul.f32 %v283_v52, %v264_v54 }
 0x119   : > { %v273_v56 = vpop.permute.xlu1 %272 }
 0x11a   : > { %v313_v57 = vpop.permute.xlu0 %312  ;;  %v296_v9 = vmul.f32 %v273_v56, %v264_v54 }
 0x11b   : > { %v335_v59 = vmul.f32 %v313_v57, %v310_v55 }
 0x11d   : > { %v341_v60 = vadd.f32 %v335_v59, %v295_v58  ;;  %v278_v61 = vpop.permute.xlu1 %277 }
 0x11e   : > { %v325_v62 = vpop.permute.xlu0 %324  ;;  %v297_v13 = vmul.f32 %v278_v61, %v264_v54 }
 0x11f   : > { %348 = vst.msk [vmem:[%s641_s8] sm:$0xff] %vm347_vm0, %v341_v60  ;;  %v338_v0 = vmul.f32 %v325_v62, %v310_v55 }
 0x121   : > { %v344_v1 = vadd.f32 %v338_v0, %v298_v63  ;;  %v288_v2 = vpop.permute.xlu1 %287 }
 0x122   : > { %v333_v3 = vpop.permute.xlu0 %332  ;;  %v299_v17 = vmul.f32 %v288_v2, %v264_v54 }
 0x123   : > { %351 = vst.msk [vmem:[%s641_s8 + $0x18] sm:$0xff] %vm347_vm0, %v344_v1  ;;  %v340_v5 = vmul.f32 %v333_v3, %v310_v55 }
 0x125   : > { %v293_v4 = vpop.permute.xlu1 %292 }
 0x126   : > { %v300_v6 = vmul.f32 %v293_v4, %v264_v54 }
 0x128   : > { %v346_v7 = vadd.f32 %v340_v5, %v300_v6 }
 0x12a   : > { %353 = vst.msk [vmem:[%s641_s8 + $0x28] sm:$0xff] %vm347_vm0, %v346_v7  ;;  %v317_v8 = vpop.permute.xlu1 %316 }
 0x12b   : > { %v336_v10 = vmul.f32 %v317_v8, %v310_v55 }
 0x12d   : > { %v342_v11 = vadd.f32 %v336_v10, %v296_v9 }
 0x12e   : > { %v321_v12 = vpop.permute.xlu1 %320 }
 0x12f   : > { %349 = vst.msk [vmem:[%s641_s8 + $0x8] sm:$0xff] %vm347_vm0, %v342_v11  ;;  %v337_v14 = vmul.f32 %v321_v12, %v310_v55 }
 0x131   : > { %v343_v15 = vadd.f32 %v337_v14, %v297_v13 }
 0x132   : > { %v329_v16 = vpop.permute.xlu1 %328 }
 0x133   : > { %350 = vst.msk [vmem:[%s641_s8 + $0x10] sm:$0xff] %vm347_vm0, %v343_v15  ;;  %v339_v18 = vmul.f32 %v329_v16, %v310_v55 }
 0x135   : > { %v345_v19 = vadd.f32 %v339_v18, %v299_v17 }
 0x137   : > { %352 = vst.msk [vmem:[%s641_s8 + $0x20] sm:$0xff] %vm347_vm0, %v345_v19 }
 0x138   : > { %502 = shalt.err (!%p499_p3)
}
 0x139   : > { %s503_s27 = scalar_lea.hbm %s658_s19, 768  ;;  %s507_s30 = scalar_lea.hbm %s709_s3, 1536 }
 0x13a   : > { %p504_p4 = scmp.ne.s32.totalorder %s658_s19, %s503_s27  ;;  %p508_p9 = scmp.lt.s32.totalorder %s658_s19, %s709_s3 }
 0x13b   : > { %p509_p10 = scmp.lt.s32.totalorder %s507_s30, %s503_s27 }
 0x13c   : > { %p505_p7 = pnand %p504_p4, %p614_p5 }
 0x13d   : > { %p510_p11 = por %p509_p10, %p508_p9 }
 0x13e   : > { %p506_p8 = pneg %p505_p7 }
 0x140   : > { %p511_p12 = pnand %p510_p11, %p506_p8 }
 0x142   : > { %514 = shalt.err (!%p511_p12)
}
 0x143   : > { %s554_s6 = smov 128   ;;  %s555_s7 = smov 8  }
 0x144   : > { %440 = dma.vmem_to_hbm [thread:$0]  (%p614_p5), %s660_s10, 768, %s658_s19, %s666_s16, %s554_s6, %s554_s6, %s555_s7  }
 0x145 PF: > { %p446_p13 = scmp.ge.s32.totalorder %s549_s15, 2  ;;  %s383_s8 = sand.u32 1, %s537_s12  }
 0x146   : > { %s384_s9 = scalar_lea.sflag [#allocation3], %s383_s8 }
 0x147   : > { %p443_p0 = pnand %p446_p13, %p618_p6 }
 0x149   : > { %p444_p1 = pneg %p443_p0 }
 0x14b   : > { %532 = dma.done.wait (%p444_p1), %s384_s9, 768  }
 0x14c   : > { %534 = vsyncadd (%p444_p1), %s384_s9, 4294966528  ;;  %p13_p2 = scmp.ge.s32.totalorder %s601_s18, 4   ;;  %s712_s12 = smov %s541_s13 }
 0x14d   : > { %s713_s13 = smov %s545_s14  ;;  %s714_s14 = smov %s612_s21 }
 0x14e   : > { %s715_s15 = smov %s601_s18  ;;  %15 = sbr.rel (!%p13_p2) target bundleno = 3 (0x3), region = 67 }
 0x153   :  { %389 = vsyncpa [#allocation3], 1 }
 0x154   :  { %391 = vsyncpa [#allocation3 + $0x1], 1 }

// kernel: ddn_forward.13
= control target key start
LH: loop header
LB: loop body
LE: loop exit
PB: predicated region body
PF: predicated region fallthrough
CT: control target
= control target key end

     0   :  { %8 = vsyncpa [#allocation3], 0  ;;  %s945_s0 = inlined_call_operand.vmem [shape: bf16[2,6,4,4], index: 0, kind: input, shape index: {}]   ;;  %s946_s1 = inlined_call_operand.vmem [shape: f32[8,4], index: 1, kind: input, shape index: {}]   ;;  %s947_s2 = inlined_call_operand.vmem [shape: f32[4,8], index: 2, kind: input, shape index: {}]   ;;  %s948_s3 = inlined_call_operand.hbm [shape: f32[2,6,8,8], index: 3, kind: output, shape index: {}]  }
   0x1   :  { %10 = vsyncpa [#allocation3 + $0x1], 0  ;;  %s750_s12 = smov 0   ;;  %s752_s13 = smov 0  }
   0x2   :  { %s754_s14 = smov 0   ;;  %s756_s15 = smov 0  }
   0x3 LB: > { %s771_s16 = sadd.s32 4294967295, %s721_s15   ;;  %s593_s17 = sadd.s32 4294967294, %s721_s15   ;;  %s721_s15 = sphi %s756_s15, %s954_s15   ;;  %s717_s14 = sphi %s754_s14, %s953_s14   ;;  %s713_s13 = sphi %s752_s13, %s952_s13   ;;  %s709_s12 = sphi %s750_s12, %s951_s12  }
   0x4   : > { %s775_s18 = sadd.s32 1, %s721_s15   ;;  %s91_s19 = sadd.s32 1, %s717_s14 }
   0x5   : > { %s88_s20 = ssub.s32 %s721_s15, %s775_s18  ;;  %p101_p0 = scmp.ne.s32.totalorder %s717_s14, %s713_s13 }
   0x6   : > { %p89_p1 = scmp.eq.s32.totalorder %s88_s20, 0  ;;  %p102_p2 = scmp.eq.s32.totalorder %s771_s16, 1 }
   0x7   : > { %p107_p3 = scmp.ne.s32.totalorder %s713_s13, %s709_s12  ;;  %p108_p4 = scmp.eq.s32.totalorder %s593_s17, 1 }
   0x8   : > { %s786_s21 = scalar_select %p89_p1, %s717_s14, %s91_s19  }
   0x9   : > { %p788_p5 = por %p102_p2, %p101_p0  ;;  %p792_p6 = por %p108_p4, %p107_p3 }
   0xa   : > { %p596_p7 = scmp.ge.s32.totalorder %s721_s15, 1  ;;  %p140_p8 = scmp.lt.s32.totalorder %s721_s15, 3 }
   0xc   : > { %p141_p9 = pnand %p596_p7, %p140_p8 }
   0xd   : > { %p164_p10 = scmp.lt.s32.totalorder (!%p141_p9), %s771_s16, 1  ;;  %s161_s6 = sand.u32 (!%p141_p9), 1, %s713_s13  }
   0xe   : > { %144 = sbr.rel (%p141_p9) target bundleno = 355 (0x163), region = 32  ;;  %s727_s24 = smov (!%p141_p9), [#allocation2]  }
   0xf   : > { %s601_s7 = smul.u32 (!%p141_p9), 48, %s161_s6  ;;  %s665_s25 = sshll.u32 (!%p141_p9), %s727_s24, 4  ;;  %s666_s25 = int_to_ptr.vmem [resolvable:$false] %s665_s25 }
  0x10   : > { %s603_s9 = smul.u32 (!%p141_p9), 768, %s771_s16 }
  0x11   : > { %s879_s8 = scalar_lea.vmem (!%p141_p9), [#allocation2], %s601_s7 }
  0x12   : > { %s531_s10 = sshll.u32 (!%p141_p9), %s879_s8, 4  ;;  %s899_s19 = scalar_lea.hbm (!%p141_p9), %s948_s3, %s603_s9  ;;  %s894_s10 = int_to_ptr.vmem [resolvable:$true] %s531_s10 }
  0x13   : > { %v181_v0 = vld [vmem:[%s946_s1] sm:$0xff]  ;;  %v723_v1 = vmov 0   ;;  %v724_v2 = vmov 2   ;;  %v725_v3 = vmov 1   ;;  %v726_v4 = vmov 3   ;;  %s165_s26 = scalar_select %p164_p10, %s771_s16, 1 }
  0x14   : > { %649 = vset.pattern.permute.xlu0 %v723_v1  ;;  %651 = vset.pattern.permute.xlu1 %v724_v2  ;;  %v188_v5 = vlaneseq  ;;  %vm510_vm0 = vcmask 64512   ;;  %s905_s16 = scalar_lea.sflag [#allocation3], %s161_s6  ;;  %s661_s20 = scalar_lea.vmem %s894_s10, 768 }
  0x15   : > { %185 = vperm.xlu0 %649, %v181_v0   ;;  %265 = vperm.xlu1 %651, %v181_v0   ;;  %s602_s27 = smul.u32 12, %s165_s26  ;;  %p662_p11 = scmp.ne.s32.totalorder %s894_s10, %s661_s20 }
  0x16   : > { %v189_v6 = vshrl.u32 %v188_v5, 7  ;;  %s667_s26 = scalar_lea.vmem %s666_s25, 1536  ;;  %p668_p0 = scmp.lt.s32.totalorder %s894_s10, %s666_s25 }
  0x17   : > { %s168_s30 = scalar_lea.vmem %s945_s0, %s602_s27  ;;  %p663_p12 = pnand %p662_p11, %p788_p5 }
  0x18   : > { %v169_v7 = vld [vmem:[%s168_s30] sm:$0x3]  ;;  %v170_v8 = vld [vmem:[%s168_s30 + $0x2] sm:$0x3]  ;;  %v171_v9 = vld [vmem:[%s168_s30 + $0x4] sm:$0x3]  ;;  %p669_p1 = scmp.lt.s32.totalorder %s667_s26, %s661_s20 }
  0x19   : > { %650 = vset.pattern.permute.xlu0 %v725_v3  ;;  %652 = vset.pattern.permute.xlu1 %v726_v4  ;;  %v172_v10 = vld [vmem:[%s168_s30 + $0x6] sm:$0x3]  ;;  %v173_v11 = vld [vmem:[%s168_s30 + $0x8] sm:$0x3]  ;;  %v174_v12 = vld [vmem:[%s168_s30 + $0xa] sm:$0x3]  ;;  %v175_v14 = vunpack.c.l.bf16 %v169_v7  ;;  %v176_v15 = vunpack.c.l.bf16 %v170_v8  ;;  %v177_v16 = vunpack.c.l.bf16 %v171_v9  ;;  %p664_p13 = pneg %p663_p12 }
  0x1a   : > { %225 = vperm.xlu0 %650, %v181_v0   ;;  %305 = vperm.xlu1 %652, %v181_v0   ;;  %v809_v13 = vsub.s32 0, %v189_v6  ;;  %v811_v17 = vsub.s32 1, %v189_v6  ;;  %v813_v18 = vunpack.c.l.bf16 %v172_v10  ;;  %v179_v19 = vunpack.c.l.bf16 %v173_v11  ;;  %p670_p2 = por %p669_p1, %p668_p0 }
  0x1b   : > { %v815_v20 = vunpack.c.l.bf16 %v174_v12  ;;  %v817_v21 = vsub.s32 2, %v189_v6  ;;  %v819_v22 = vsub.s32 3, %v189_v6 }
  0x1c   : > { %v191_v24 = vrot.slane %v175_v14, %v809_v13  ;;  %v195_v25 = vrot.slane %v176_v15, %v809_v13  ;;  %v199_v26 = vrot.slane %v177_v16, %v809_v13  ;;  %v231_v28 = vrot.slane %v175_v14, %v811_v17  ;;  %p671_p3 = pnand %p670_p2, %p664_p13 }
  0x1d   : > { %v203_v29 = vrot.slane %v813_v18, %v809_v13  ;;  %v207_v30 = vrot.slane %v179_v19, %v809_v13  ;;  %v211_v31 = vrot.slane %v815_v20, %v809_v13  ;;  %v235_v32 = vrot.slane %v176_v15, %v811_v17 }
  0x1e   : > { %653 = vset.pattern.permute.xlu1 %v723_v1  ;;  %654 = vset.pattern.permute.xlu0 %v723_v1  ;;  %v239_v33 = vrot.slane %v177_v16, %v811_v17  ;;  %v243_v34 = vrot.slane %v813_v18, %v811_v17  ;;  %v247_v35 = vrot.slane %v179_v19, %v811_v17 }
  0x1f   : > { %v275_v36 = vrot.slane %v176_v15, %v817_v21  ;;  %v251_v37 = vrot.slane %v815_v20, %v811_v17  ;;  %v315_v38 = vrot.slane %v176_v15, %v819_v22  ;;  %v271_v39 = vrot.slane %v175_v14, %v817_v21 }
  0x20   : > { %v311_v40 = vrot.slane %v175_v14, %v819_v22  ;;  %v287_v41 = vrot.slane %v179_v19, %v817_v21  ;;  %v327_v42 = vrot.slane %v179_v19, %v819_v22  ;;  %v279_v43 = vrot.slane %v177_v16, %v817_v21 }
  0x21   : > { %v319_v44 = vrot.slane %v177_v16, %v819_v22  ;;  %v283_v1 = vrot.slane %v813_v18, %v817_v21  ;;  %v323_v5 = vrot.slane %v813_v18, %v819_v22  ;;  %v291_v18 = vrot.slane %v815_v20, %v817_v21 }
  0x90   : > { %v186_v23 = vpop.permute.xlu0 %185  ;;  %v824_v27 = vpop.permute.xlu1 %265 }
  0x91   : > { %v212_v45 = vmul.f32 %v191_v24, %v186_v23  ;;  %v213_v46 = vmul.f32 %v195_v25, %v186_v23  ;;  %v214_v47 = vmul.f32 %v199_v26, %v186_v23  ;;  %v216_v48 = vmul.f32 %v207_v30, %v186_v23 }
  0x92   : > { %v293_v54 = vmul.f32 %v275_v36, %v824_v27  ;;  %v292_v58 = vmul.f32 %v271_v39, %v824_v27  ;;  %v215_v63 = vmul.f32 %v203_v29, %v186_v23  ;;  %v296_v8 = vmul.f32 %v287_v41, %v824_v27 }
  0x93   : > { %v294_v9 = vmul.f32 %v279_v43, %v824_v27  ;;  %v217_v25 = vmul.f32 %v211_v31, %v186_v23  ;;  %v295_v26 = vmul.f32 %v283_v1, %v824_v27  ;;  %v331_v29 = vrot.slane %v815_v20, %v819_v22 }
  0x95   : > { %v226_v49 = vpop.permute.xlu0 %225  ;;  %v306_v50 = vpop.permute.xlu1 %305 }
  0x96   : > { %v252_v51 = vmul.f32 %v231_v28, %v226_v49  ;;  %v253_v52 = vmul.f32 %v235_v32, %v226_v49  ;;  %v254_v53 = vmul.f32 %v239_v33, %v226_v49  ;;  %v255_v55 = vmul.f32 %v243_v34, %v226_v49 }
  0x97   : > { %v256_v56 = vmul.f32 %v247_v35, %v226_v49  ;;  %v333_v57 = vmul.f32 %v315_v38, %v306_v50  ;;  %v332_v61 = vmul.f32 %v311_v40, %v306_v50  ;;  %v257_v10 = vmul.f32 %v251_v37, %v226_v49 }
  0x98   : > { %v259_v59 = vadd.f32 %v253_v52, %v213_v46  ;;  %v258_v60 = vadd.f32 %v252_v51, %v212_v45  ;;  %v260_v62 = vadd.f32 %v254_v53, %v214_v47  ;;  %v336_v11 = vmul.f32 %v327_v42, %v306_v50 }
  0x99   : > { %v262_v0 = vadd.f32 %v256_v56, %v216_v48  ;;  %v334_v12 = vmul.f32 %v319_v44, %v306_v50  ;;  %v261_v14 = vadd.f32 %v255_v55, %v215_v63  ;;  %v335_v28 = vmul.f32 %v323_v5, %v306_v50 }
  0x9a   : > { %v299_v6 = vadd.f32 %v293_v54, %v259_v59  ;;  %v298_v7 = vadd.f32 %v292_v58, %v258_v60  ;;  %v300_v24 = vadd.f32 %v294_v9, %v260_v62  ;;  %v263_v34 = vadd.f32 %v257_v10, %v217_v25 }
  0x9b   : > { %v302_v19 = vadd.f32 %v296_v8, %v262_v0  ;;  %v301_v33 = vadd.f32 %v295_v26, %v261_v14  ;;  %v297_v35 = vmul.f32 %v291_v18, %v824_v27  ;;  %v337_v36 = vmul.f32 %v331_v29, %v306_v50 }
  0x9c   : > { %v339_v15 = vadd.f32 %v333_v57, %v299_v6  ;;  %v338_v16 = vadd.f32 %v332_v61, %v298_v7  ;;  %v340_v32 = vadd.f32 %v334_v12, %v300_v24 }
  0x9d   : > { %v342_v30 = vadd.f32 %v336_v11, %v302_v19  ;;  %v341_v23 = vadd.f32 %v335_v28, %v301_v33  ;;  %v303_v31 = vadd.f32 %v297_v35, %v263_v34 }
  0x9e   : > { %355 = vperm.xlu0 %654, %v339_v15   ;;  %350 = vperm.xlu1 %653, %v338_v16  }
  0x9f   : > { %v343_v37 = vadd.f32 %v337_v36, %v303_v31 }
  0xa2   : > { %370 = vperm.xlu0 %654, %v342_v30   ;;  %360 = vperm.xlu1 %653, %v340_v32  }
  0xa6   : > { %655 = vset.pattern.permute.xlu0 %v725_v3  ;;  %365 = vperm.xlu1 %653, %v341_v23  }
  0xa7   : > { %395 = vperm.xlu0 %655, %v338_v16  }
  0xaa   : > { %375 = vperm.xlu1 %653, %v343_v37  }
  0xab   : > { %407 = vperm.xlu0 %655, %v341_v23  }
  0xae   : > { %656 = vset.pattern.permute.xlu1 %v725_v3 }
  0xaf   : > { %415 = vperm.xlu0 %655, %v343_v37   ;;  %399 = vperm.xlu1 %656, %v339_v15  }
  0xb3   : > { %658 = vset.pattern.permute.xlu0 %v724_v2  ;;  %403 = vperm.xlu1 %656, %v340_v32  }
  0xb4   : > { %439 = vperm.xlu0 %658, %v339_v15  }
  0xb7   : > { %411 = vperm.xlu1 %656, %v342_v30  }
  0xb8   : > { %451 = vperm.xlu0 %658, %v342_v30  }
  0xbb   : > { %657 = vset.pattern.permute.xlu1 %v724_v2 }
  0xbc   : > { %659 = vset.pattern.permute.xlu0 %v726_v4  ;;  %435 = vperm.xlu1 %657, %v338_v16  }
  0xbd   : > { %475 = vperm.xlu0 %659, %v338_v16  }
  0xc0   : > { %443 = vperm.xlu1 %657, %v340_v32  }
  0xc1   : > { %487 = vperm.xlu0 %659, %v341_v23  }
  0xc4   : > { %447 = vperm.xlu1 %657, %v341_v23  }
  0xc5   : > { %495 = vperm.xlu0 %659, %v343_v37  }
  0xc8   : > { %455 = vperm.xlu1 %657, %v343_v37  }
  0xcc   : > { %660 = vset.pattern.permute.xlu1 %v726_v4  ;;  %v182_v4 = vld [vmem:[%s947_s2] sm:$0xf] }
  0xcd   : > { %479 = vperm.xlu1 %660, %v339_v15   ;;  %v393_v46 = vrot.slane %v182_v4, %v811_v17  ;;  %v347_v47 = vrot.slane %v182_v4, %v809_v13  ;;  %v473_v51 = vrot.slane %v182_v4, %v819_v22  ;;  %v433_v53 = vrot.slane %v182_v4, %v817_v21 }
  0xd1   : > { %483 = vperm.xlu1 %660, %v340_v32  }
  0xd5   : > { %491 = vperm.xlu1 %660, %v342_v30  }
 0x119   : > { %v356_v3 = vpop.permute.xlu0 %355  ;;  %v351_v20 = vpop.permute.xlu1 %350 }
 0x11a   : > { %v378_v52 = vmul.f32 %v351_v20, %v347_v47  ;;  %v379_v14 = vmul.f32 %v356_v3, %v347_v47 }
 0x11d   : > { %v867_v27 = vpop.permute.xlu0 %370  ;;  %v361_v2 = vpop.permute.xlu1 %360 }
 0x11e   : > { %v380_v26 = vmul.f32 %v361_v2, %v347_v47  ;;  %v382_v34 = vmul.f32 %v867_v27, %v347_v47 }
 0x121   : > { %v366_v38 = vpop.permute.xlu1 %365 }
 0x122   : > { %v396_v39 = vpop.permute.xlu0 %395  ;;  %v381_v62 = vmul.f32 %v366_v38, %v347_v47 }
 0x123   : > { %v418_v50 = vmul.f32 %v396_v39, %v393_v46 }
 0x125   : > { %v376_v40 = vpop.permute.xlu1 %375  ;;  %v424_v55 = vadd.f32 %v418_v50, %v378_v52 }
 0x126   : > { %v408_v41 = vpop.permute.xlu0 %407  ;;  %v383_v1 = vmul.f32 %v376_v40, %v347_v47 }
 0x127   : > { %v421_v13 = vmul.f32 %v408_v41, %v393_v46 }
 0x129   : > { %v427_v22 = vadd.f32 %v421_v13, %v381_v62 }
 0x12a   : > { %v416_v42 = vpop.permute.xlu0 %415  ;;  %v400_v43 = vpop.permute.xlu1 %399 }
 0x12b   : > { %v423_v63 = vmul.f32 %v416_v42, %v393_v46  ;;  %v419_v7 = vmul.f32 %v400_v43, %v393_v46 }
 0x12d   : > { %v429_v10 = vadd.f32 %v423_v63, %v383_v1  ;;  %v425_v24 = vadd.f32 %v419_v7, %v379_v14 }
 0x12e   : > { %v404_v44 = vpop.permute.xlu1 %403 }
 0x12f   : > { %v440_v45 = vpop.permute.xlu0 %439  ;;  %v420_v25 = vmul.f32 %v404_v44, %v393_v46 }
 0x130   : > { %v459_v15 = vmul.f32 %v440_v45, %v433_v53 }
 0x131   : > { %v426_v35 = vadd.f32 %v420_v25, %v380_v26 }
 0x132   : > { %v412_v48 = vpop.permute.xlu1 %411  ;;  %v465_v29 = vadd.f32 %v459_v15, %v425_v24 }
 0x133   : > { %v452_v49 = vpop.permute.xlu0 %451  ;;  %v422_v30 = vmul.f32 %v412_v48, %v393_v46 }
 0x134   : > { %v462_v37 = vmul.f32 %v452_v49, %v433_v53 }
 0x135   : > { %v428_v36 = vadd.f32 %v422_v30, %v382_v34 }
 0x137   : > { %v436_v54 = vpop.permute.xlu1 %435  ;;  %v468_v39 = vadd.f32 %v462_v37, %v428_v36 }
 0x138   : > { %v458_v56 = vmul.f32 %v436_v54, %v433_v53  ;;  %v476_v57 = vpop.permute.xlu0 %475 }
 0x139   : > { %v498_v58 = vmul.f32 %v476_v57, %v473_v51 }
 0x13a   : > { %v464_v59 = vadd.f32 %v458_v56, %v424_v55 }
 0x13b   : > { %v444_v17 = vpop.permute.xlu1 %443 }
 0x13c   : > { %v504_v60 = vadd.f32 %v498_v58, %v464_v59  ;;  %v488_v61 = vpop.permute.xlu0 %487  ;;  %v460_v32 = vmul.f32 %v444_v17, %v433_v53 }
 0x13d   : > { %v501_v5 = vmul.f32 %v488_v61, %v473_v51 }
 0x13e   : > { %511 = vst.msk [vmem:[%s879_s8] sm:$0xff] %vm510_vm0, %v504_v60  ;;  %v466_v3 = vadd.f32 %v460_v32, %v426_v35 }
 0x13f   : > { %v448_v21 = vpop.permute.xlu1 %447 }
 0x140   : > { %v461_v0 = vmul.f32 %v448_v21, %v433_v53  ;;  %v496_v8 = vpop.permute.xlu0 %495 }
 0x141   : > { %v503_v16 = vmul.f32 %v496_v8, %v473_v51 }
 0x142   : > { %v467_v6 = vadd.f32 %v461_v0, %v427_v22 }
 0x143   : > { %v456_v9 = vpop.permute.xlu1 %455 }
 0x144   : > { %v507_v11 = vadd.f32 %v501_v5, %v467_v6  ;;  %v463_v12 = vmul.f32 %v456_v9, %v433_v53 }
 0x146   : > { %514 = vst.msk [vmem:[%s879_s8 + $0x18] sm:$0xff] %vm510_vm0, %v507_v11  ;;  %v469_v19 = vadd.f32 %v463_v12, %v429_v10 }
 0x148   : > { %v509_v18 = vadd.f32 %v503_v16, %v469_v19  ;;  %v480_v28 = vpop.permute.xlu1 %479 }
 0x149   : > { %v499_v33 = vmul.f32 %v480_v28, %v473_v51 }
 0x14a   : > { %516 = vst.msk [vmem:[%s879_s8 + $0x28] sm:$0xff] %vm510_vm0, %v509_v18 }
 0x14b   : > { %v505_v23 = vadd.f32 %v499_v33, %v465_v29 }
 0x14c   : > { %v484_v31 = vpop.permute.xlu1 %483 }
 0x14d   : > { %512 = vst.msk [vmem:[%s879_s8 + $0x8] sm:$0xff] %vm510_vm0, %v505_v23  ;;  %v500_v20 = vmul.f32 %v484_v31, %v473_v51 }
 0x14f   : > { %v506_v2 = vadd.f32 %v500_v20, %v466_v3 }
 0x150   : > { %v492_v38 = vpop.permute.xlu1 %491 }
 0x151   : > { %513 = vst.msk [vmem:[%s879_s8 + $0x10] sm:$0xff] %vm510_vm0, %v506_v2  ;;  %v502_v27 = vmul.f32 %v492_v38, %v473_v51 }
 0x153   : > { %v508_v40 = vadd.f32 %v502_v27, %v468_v39 }
 0x155   : > { %515 = vst.msk [vmem:[%s879_s8 + $0x20] sm:$0xff] %vm510_vm0, %v508_v40 }
 0x156   : > { %674 = shalt.err (!%p671_p3)
}
 0x157   : > { %s675_s27 = scalar_lea.hbm %s899_s19, 768  ;;  %s679_s30 = scalar_lea.hbm %s948_s3, 1536 }
 0x158   : > { %p676_p4 = scmp.ne.s32.totalorder %s899_s19, %s675_s27  ;;  %p680_p9 = scmp.lt.s32.totalorder %s899_s19, %s948_s3 }
 0x159   : > { %p681_p10 = scmp.lt.s32.totalorder %s679_s30, %s675_s27 }
 0x15a   : > { %p677_p7 = pnand %p676_p4, %p788_p5 }
 0x15b   : > { %p682_p11 = por %p681_p10, %p680_p9 }
 0x15c   : > { %p678_p8 = pneg %p677_p7 }
 0x15e   : > { %p683_p12 = pnand %p682_p11, %p678_p8 }
 0x160   : > { %686 = shalt.err (!%p683_p12)
}
 0x161   : > { %s728_s6 = smov 128   ;;  %s729_s7 = smov 8  }
 0x162   : > { %604 = dma.vmem_to_hbm [thread:$0]  (%p788_p5), %s894_s10, 768, %s899_s19, %s905_s16, %s728_s6, %s728_s6, %s729_s7  }
 0x163 PF: > { %p610_p13 = scmp.ge.s32.totalorder %s721_s15, 2  ;;  %s546_s8 = sand.u32 1, %s709_s12  }
 0x164   : > { %s547_s9 = scalar_lea.sflag [#allocation3], %s546_s8 }
 0x165   : > { %p607_p0 = pnand %p610_p13, %p792_p6 }
 0x167   : > { %p608_p1 = pneg %p607_p0 }
 0x169   : > { %704 = dma.done.wait (%p608_p1), %s547_s9, 768  }
 0x16a   : > { %706 = vsyncadd (%p608_p1), %s547_s9, 4294966528  ;;  %p13_p2 = scmp.ge.s32.totalorder %s775_s18, 4   ;;  %s951_s12 = smov %s713_s13 }
 0x16b   : > { %s952_s13 = smov %s717_s14  ;;  %s953_s14 = smov %s786_s21 }
 0x16c   : > { %s954_s15 = smov %s775_s18  ;;  %15 = sbr.rel (!%p13_p2) target bundleno = 3 (0x3), region = 67 }
 0x171   :  { %552 = vsyncpa [#allocation3], 1 }
 0x172   :  { %554 = vsyncpa [#allocation3 + $0x1], 1 }

</bundles_post_ra>
